<compile_context>
chip_gen: v7x
topology: tpu7x:2x2x1
jax: 0.10.0
libtpu: 0.0.40
codegen_flags: <defaults>
</compile_context>

<pallas_src>
import functools
import math

import jax
import jax.numpy as jnp
import numpy as np
from jax.experimental import pallas as pl
from jax.experimental.pallas import tpu as pltpu


def _round_up(x, m):
    return (x + m - 1) // m * m


def _pick_vmem_limit():
    try:
        kind = jax.devices()[0].device_kind.lower()
    except Exception:
        return 48 * 1024 * 1024
    if "v5" in kind or "v6" in kind:
        return 96 * 1024 * 1024       # v5e/v6e have 128 MiB physical VMEM
    return 48 * 1024 * 1024           # v7x (64 MiB physical) and unknown parts


_VMEM_LIMIT = _pick_vmem_limit()


# --------------------------------------------------------------------------
# Pallas kernel 1: tiled matmul + fused {dequant scale, bias, residual, ReLU}
# --------------------------------------------------------------------------
def _mm_kernel(*refs, act, has_scale, has_res, single_k):
    i = 0
    a_ref = refs[i]; i += 1
    b_ref = refs[i]; i += 1
    bias_ref = refs[i]; i += 1
    scale_ref = None
    res_ref = None
    if has_scale:
        scale_ref = refs[i]; i += 1
    if has_res:
        res_ref = refs[i]; i += 1
    o_ref = refs[i]; i += 1
    acc_ref = None
    if not single_k:
        acc_ref = refs[i]

    b = b_ref[...]
    if b.dtype == jnp.int8:
        b = b.astype(jnp.bfloat16)          # int8 weights dequant to bf16 in VMEM
    part = jnp.dot(a_ref[...], b, preferred_element_type=jnp.float32)

    def _epilogue(r):
        if has_scale:
            r = r * scale_ref[...]
        r = r + bias_ref[...]
        if has_res:
            r = r + res_ref[...].astype(jnp.float32)
        if act == "relu":
            r = jnp.maximum(r, 0.0)
        o_ref[...] = r.astype(o_ref.dtype)

    if single_k:
        _epilogue(part)
    else:
        @pl.when(pl.program_id(2) == 0)
        def _init():
            acc_ref[...] = jnp.zeros_like(acc_ref)

        acc_ref[...] += part

        @pl.when(pl.program_id(2) == pl.num_programs(2) - 1)
        def _fin():
            _epilogue(acc_ref[...])


@functools.partial(jax.jit, static_argnames=("act", "out_dtype"))
def matmul_bias_act(a, b, bias, scale=None, res=None, act=None,
                    out_dtype=jnp.bfloat16):
    """(M,K) @ (K,N) [* scale] + bias [+ res], optional ReLU. f32 accumulate."""
    M, K = a.shape
    K2, N = b.shape
    assert K == K2
    thin = M <= 64
    if M >= 65536:
        tm = 1024
    elif M >= 512:
        tm = 512
    elif M >= 256:
        tm = 256
    elif M >= 128:
        tm = 128
    else:
        tm = _round_up(M, 8)
    b_item = 1 if b.dtype == jnp.int8 else 2
    if N < 128:
        tn = N
    else:
        tn = min(4096 if thin else 512, _round_up(N, 128))
    tk = min(8192 if thin else 2048, _round_up(K, 128))
    while tk * tn * b_item > 2 * 1024 * 1024 and tk > 512:
        tk //= 2
    Mp, Kp, Np = _round_up(M, tm), _round_up(K, tk), _round_up(N, tn)
    single_k = (Kp == tk)

    a_p = a.astype(jnp.bfloat16)
    if (Mp, Kp) != (M, K):
        a_p = jnp.pad(a_p, ((0, Mp - M), (0, Kp - K)))
    b_p = b if (Kp == K and Np == N) else jnp.pad(b, ((0, Kp - K), (0, Np - N)))
    bias_p = jnp.pad(bias.astype(jnp.float32), (0, Np - N)).reshape(1, Np)

    grid = (Mp // tm, Np // tn, Kp // tk)
    in_specs = [
        pl.BlockSpec((tm, tk), lambda i, j, k: (i, k)),
        pl.BlockSpec((tk, tn), lambda i, j, k: (k, j)),
        pl.BlockSpec((1, tn), lambda i, j, k: (0, j)),
    ]
    args = [a_p, b_p, bias_p]
    if scale is not None:
        scale_p = jnp.pad(scale.astype(jnp.float32), (0, Np - N)).reshape(1, Np)
        in_specs.append(pl.BlockSpec((1, tn), lambda i, j, k: (0, j)))
        args.append(scale_p)
    if res is not None:
        res_p = res.astype(jnp.bfloat16)
        if res.shape != (Mp, Np):
            res_p = jnp.pad(res_p, ((0, Mp - M), (0, Np - N)))
        in_specs.append(pl.BlockSpec((tm, tn), lambda i, j, k: (i, j)))
        args.append(res_p)

    out = pl.pallas_call(
        functools.partial(_mm_kernel, act=act, has_scale=scale is not None,
                          has_res=res is not None, single_k=single_k),
        out_shape=jax.ShapeDtypeStruct((Mp, Np), out_dtype),
        grid=grid,
        in_specs=in_specs,
        out_specs=pl.BlockSpec((tm, tn), lambda i, j, k: (i, j)),
        scratch_shapes=([] if single_k else [pltpu.VMEM((tm, tn), jnp.float32)]),
        compiler_params=pltpu.CompilerParams(
            dimension_semantics=("parallel", "parallel", "arbitrary"),
            vmem_limit_bytes=_VMEM_LIMIT),
    )(*args)
    if Mp == M and Np == N:
        return out
    return out[:M, :N]


# --------------------------------------------------------------------------
# Pallas kernel 2: 3x3 stride-1 'same' convolution, image resident in VMEM.
# 9 taps sliced directly from the ref, accumulated into a f32 VMEM scratch;
# bias + optional residual add + ReLU fused in the epilogue.
# --------------------------------------------------------------------------
def _conv3x3_kernel(x_ref, w_ref, b_ref, *rest, bh, ow, cin, act, has_res):
    if has_res:
        res_ref, o_ref, acc_ref = rest
    else:
        o_ref, acc_ref = rest
    oh0 = pl.multiple_of(pl.program_id(1) * bh, bh)
    tn = o_ref.shape[-1]
    for i in range(3):
        for j in range(3):
            xs = x_ref[pl.ds(oh0 + i, bh), j:j + ow, :]        # (bh, ow, cin)
            wt = w_ref[(i * 3 + j) * cin:(i * 3 + j + 1) * cin, :]
            part = jnp.dot(xs.reshape(bh * ow, cin), wt,
                           preferred_element_type=jnp.float32)
            if i == 0 and j == 0:
                acc_ref[...] = part
            else:
                acc_ref[...] += part
    r = acc_ref[...] + b_ref[...]
    if has_res:
        r = r + res_ref[...].reshape(bh * ow, tn).astype(jnp.float32)
    if act == "relu":
        r = jnp.maximum(r, 0.0)
    o_ref[...] = r.reshape(bh, ow, tn).astype(o_ref.dtype)


@functools.partial(jax.jit, static_argnames=("act", "out_dtype"))
def conv3x3_s1(x, w, bias, res=None, act=None, out_dtype=jnp.bfloat16):
    """x: (N,H,W,C) -> (N,H,W,Cout); w: (3,3,C,Cout); optional fused residual."""
    N, H, W, C = x.shape
    Cout = w.shape[-1]
    xp = jnp.pad(x.astype(jnp.bfloat16), ((0, 0), (1, 1), (1, 1), (0, 0)))
    w2 = w.reshape(9 * C, Cout).astype(jnp.bfloat16)
    b2 = bias.astype(jnp.float32).reshape(1, Cout)
    bh = int(min(H, max(1, 2048 // W)))          # bh*W ~ 2048 matmul rows
    tn = Cout if Cout <= 256 else 256
    grid = (N, H // bh, Cout // tn)
    in_specs = [
        pl.BlockSpec((None, H + 2, W + 2, C), lambda n, o, c: (n, 0, 0, 0)),
        pl.BlockSpec((9 * C, tn), lambda n, o, c: (0, c)),
        pl.BlockSpec((1, tn), lambda n, o, c: (0, c)),
    ]
    args = [xp, w2, b2]
    if res is not None:
        in_specs.append(pl.BlockSpec((None, bh, W, tn),
                                     lambda n, o, c: (n, o, 0, c)))
        args.append(res.astype(jnp.bfloat16))
    return pl.pallas_call(
        functools.partial(_conv3x3_kernel, bh=bh, ow=W, cin=C, act=act,
                          has_res=res is not None),
        out_shape=jax.ShapeDtypeStruct((N, H, W, Cout), out_dtype),
        grid=grid,
        in_specs=in_specs,
        out_specs=pl.BlockSpec((None, bh, W, tn), lambda n, o, c: (n, o, 0, c)),
        scratch_shapes=[pltpu.VMEM((bh * W, tn), jnp.float32)],
        compiler_params=pltpu.CompilerParams(
            dimension_semantics=("parallel", "parallel", "parallel"),
            vmem_limit_bytes=_VMEM_LIMIT),
    )(*args)


# --------------------------------------------------------------------------
# Pallas kernels 3: bilinear resize (two small matmul passes, no transposes),
# optional residual add (upsample_add) fused into the second pass.
# --------------------------------------------------------------------------
def _resize_h_kernel(a_ref, x_ref, o_ref):
    o_ref[...] = jnp.dot(a_ref[...], x_ref[...],
                         preferred_element_type=jnp.float32).astype(o_ref.dtype)


def _resize_w_kernel(a_ref, t_ref, *rest, bh, has_res):
    if has_res:
        res_ref, o_ref = rest
    else:
        (o_ref,) = rest
    a = a_ref[...]
    for r in range(bh):
        v = jnp.dot(a, t_ref[r], preferred_element_type=jnp.float32)
        if has_res:
            v = v + res_ref[r].astype(jnp.float32)
        o_ref[r] = v.astype(o_ref.dtype)


def _interp_matrix(in_size, out_size, align_corners):
    idx = np.arange(out_size, dtype=np.float64)
    if align_corners:
        src = (idx * (in_size - 1) / (out_size - 1) if out_size > 1
               else np.zeros(out_size))
    else:
        src = np.maximum((idx + 0.5) * (in_size / out_size) - 0.5, 0.0)
    src = np.minimum(src, in_size - 1)
    lo = np.floor(src).astype(np.int64)
    hi = np.minimum(lo + 1, in_size - 1)
    w = src - lo
    A = np.zeros((out_size, in_size), np.float64)
    A[np.arange(out_size), lo] += 1.0 - w
    A[np.arange(out_size), hi] += w
    return A.astype(np.float32)


@functools.partial(jax.jit,
                   static_argnames=("oh", "ow", "align_corners", "out_dtype"))
def resize_bilinear(x, oh, ow, align_corners, res=None, out_dtype=jnp.bfloat16):
    N, H, W, C = x.shape
    Ah = jnp.asarray(_interp_matrix(H, oh, align_corners), jnp.bfloat16)
    Aw = jnp.asarray(_interp_matrix(W, ow, align_corners), jnp.bfloat16)

    # Pass 1: per-batch H-axis interpolation, t[n] = Ah @ x[n].reshape(H, W*C).
    x2 = x.astype(jnp.bfloat16).reshape(N, H, W * C)
    bv = oh
    while bv * W * C * 2 > 2 * 1024 * 1024 and bv % 2 == 0 and bv > 8:
        bv //= 2
    t = pl.pallas_call(
        _resize_h_kernel,
        out_shape=jax.ShapeDtypeStruct((N, oh, W * C), jnp.bfloat16),
        grid=(N, oh // bv),
        in_specs=[pl.BlockSpec((bv, H), lambda n, v: (v, 0)),
                  pl.BlockSpec((None, H, W * C), lambda n, v: (n, 0, 0))],
        out_specs=pl.BlockSpec((None, bv, W * C), lambda n, v: (n, v, 0)),
        compiler_params=pltpu.CompilerParams(
            dimension_semantics=("parallel", "parallel"),
            vmem_limit_bytes=_VMEM_LIMIT),
    )(Ah, x2).reshape(N, oh, W, C)

    # Pass 2: per-row W-axis interpolation + fused residual add.
    bh = 8
    in_specs = [pl.BlockSpec((ow, W), lambda n, v: (0, 0)),
                pl.BlockSpec((None, bh, W, C), lambda n, v: (n, v, 0, 0))]
    args = [Aw, t]
    if res is not None:
        in_specs.append(pl.BlockSpec((None, bh, ow, C),
                                     lambda n, v: (n, v, 0, 0)))
        args.append(res.astype(jnp.bfloat16))
    return pl.pallas_call(
        functools.partial(_resize_w_kernel, bh=bh, has_res=res is not None),
        out_shape=jax.ShapeDtypeStruct((N, oh, ow, C), out_dtype),
        grid=(N, oh // bh),
        in_specs=in_specs,
        out_specs=pl.BlockSpec((None, bh, ow, C), lambda n, v: (n, v, 0, 0)),
        compiler_params=pltpu.CompilerParams(
            dimension_semantics=("parallel", "parallel"),
            vmem_limit_bytes=_VMEM_LIMIT),
    )(*args)


def upsample_add(x, y):
    return resize_bilinear(x, oh=y.shape[1], ow=y.shape[2],
                           align_corners=False, res=y)


def cus_sample_scale2(x):
    return resize_bilinear(x, oh=x.shape[1] * 2, ow=x.shape[2] * 2,
                           align_corners=True)


# --------------------------------------------------------------------------
# Pallas kernel 4: multi-head attention core (QK^T, softmax, PV) on the MXU
# --------------------------------------------------------------------------
def _attn_kernel(q_ref, k_ref, v_ref, o_ref, *, scale, L, D):
    th = q_ref.shape[0]
    q = q_ref[...].astype(jnp.float32).reshape(th, L, D) * scale
    k = k_ref[...].astype(jnp.float32).reshape(th, L, D)
    v = v_ref[...].astype(jnp.float32).reshape(th, L, D)
    s = jnp.einsum("bqd,bkd->bqk", q, k, preferred_element_type=jnp.float32)
    s = s - jnp.max(s, axis=-1, keepdims=True)
    p = jnp.exp(s)
    p = p / jnp.sum(p, axis=-1, keepdims=True)          # exact softmax
    o = jnp.einsum("bqk,bkd->bqd", p, v, preferred_element_type=jnp.float32)
    o_ref[...] = o.reshape(th, L * D).astype(o_ref.dtype)


@functools.partial(jax.jit, static_argnames=("L", "D"))
def attention_core(q2, k2, v2, L, D):
    NH = q2.shape[0]
    th = 128 if NH % 128 == 0 else (8 if NH % 8 == 0 else NH)
    scale = 1.0 / math.sqrt(D)
    return pl.pallas_call(
        functools.partial(_attn_kernel, scale=scale, L=L, D=D),
        out_shape=jax.ShapeDtypeStruct((NH, L * D), jnp.float32),
        grid=(NH // th,),
        in_specs=[pl.BlockSpec((th, L * D), lambda h: (h, 0))] * 3,
        out_specs=pl.BlockSpec((th, L * D), lambda h: (h, 0)),
        compiler_params=pltpu.CompilerParams(dimension_semantics=("parallel",)),
    )(q2, k2, v2)


# --------------------------------------------------------------------------
# Generic conv (im2col path) for 7x7/s2, 3x3/s2, 1x1 and the big deconv
# --------------------------------------------------------------------------
@functools.partial(jax.jit, static_argnames=("stride", "pad", "act", "out_dtype"))
def conv2d(x, w, bias, stride, pad, act=None, out_dtype=jnp.bfloat16):
    N, H, W, Cin = x.shape
    kh, kw, _, cout = w.shape
    x = x.astype(jnp.bfloat16)
    wm = w.reshape(kh * kw * Cin, cout)
    if kh == 1 and kw == 1 and pad == 0:
        xs = x[:, ::stride, ::stride, :]
        OH, OW = xs.shape[1], xs.shape[2]
        patches = xs.reshape(N * OH * OW, Cin)
    else:
        xp = jnp.pad(x, ((0, 0), (pad, pad), (pad, pad), (0, 0)))
        OH = (H + 2 * pad - kh) // stride + 1
        OW = (W + 2 * pad - kw) // stride + 1
        cols = []
        for i in range(kh):
            for j in range(kw):
                cols.append(xp[:, i:i + stride * (OH - 1) + 1:stride,
                               j:j + stride * (OW - 1) + 1:stride, :])
        patches = jnp.concatenate(cols, axis=-1).reshape(N * OH * OW,
                                                         kh * kw * Cin)
    y = matmul_bias_act(patches, wm, bias, act=act, out_dtype=out_dtype)
    return y.reshape(N, OH, OW, cout)


def conv_block(x, cp, stride, pad, act=None, res=None, out_dtype=jnp.bfloat16):
    """Conv (+folded BN) + optional fused residual add + optional ReLU."""
    w, b = cp["w"], cp["b"]
    kh, kw = w.shape[0], w.shape[1]
    if kh == 3 and kw == 3 and stride == 1 and pad == 1 and x.shape[-1] >= 32:
        return conv3x3_s1(x, w, b, res=res, act=act, out_dtype=out_dtype)
    y = conv2d(x, w, b, stride=stride, pad=pad,
               act=None if res is not None else act, out_dtype=out_dtype)
    if res is not None:   # not hit with the current shapes; kept for safety
        y = y + res.astype(y.dtype)
        if act == "relu":
            y = jnp.maximum(y, 0).astype(y.dtype)
    return y


def maxpool_3x3_s2_p1(x):
    # TODO(synk): max-pool kept in plain JAX (tiny vs. the matmul paths).
    N, H, W, C = x.shape
    neg = jnp.finfo(x.dtype).min
    xp = jnp.pad(x, ((0, 0), (1, 1), (1, 1), (0, 0)), constant_values=neg)
    OH = (H + 2 - 3) // 2 + 1
    OW = (W + 2 - 3) // 2 + 1
    out = None
    for i in range(3):
        for j in range(3):
            s = xp[:, i:i + 2 * (OH - 1) + 1:2, j:j + 2 * (OW - 1) + 1:2, :]
            out = s if out is None else jnp.maximum(out, s)
    return out


# --------------------------------------------------------------------------
# ResNet18 backbone (reconstructed) with fused residual adds
# --------------------------------------------------------------------------
def run_block(x, bp, stride):
    sc = conv_block(x, bp["down"], stride, 0, act=None) if "down" in bp else x
    h = conv_block(x, bp["conv1"], stride, 1, act="relu")
    return conv_block(h, bp["conv2"], 1, 1, act="relu", res=sc)


def run_layer(x, lp, stride):
    x = run_block(x, lp[0], stride)
    return run_block(x, lp[1], 1)


# --------------------------------------------------------------------------
# Transformer (LayerNorm + MultiheadAttention + MLP), NHWC layout throughout
# --------------------------------------------------------------------------
def layernorm_w(x, gamma, beta):
    """LayerNorm over the W axis (axis=2) of NHWC, matching nn.LayerNorm(8)
    applied to the last dim of the NCHW reference tensor.
    TODO(synk): kept in plain XLA — the tensor is ~0.5MB and an (R,8) Pallas
    layout would waste 15/16 of the lanes."""
    xf = x.astype(jnp.float32)
    mu = jnp.mean(xf, axis=2, keepdims=True)
    var = jnp.mean(jnp.square(xf - mu), axis=2, keepdims=True)
    y = (xf - mu) * jax.lax.rsqrt(var + 1e-5)
    y = y * gamma[None, None, :, None] + beta[None, None, :, None]
    return y.astype(x.dtype)


def multihead_attention(p, x_rows, res_rows, L, Nn, E):
    """x_rows: (L*Nn, E) with rows ordered (l, n); residual fused into out-proj."""
    Hh = p["num_heads"]
    Dh = E // Hh
    qkv = matmul_bias_act(x_rows, p["w_in"], p["b_in"], act=None)
    q, k, v = qkv[:, :E], qkv[:, E:2 * E], qkv[:, 2 * E:]

    def to_heads(t):    # (L*Nn, E) -> (Nn*Hh, L*Dh)
        return t.reshape(L, Nn, Hh, Dh).transpose(1, 2, 0, 3).reshape(Nn * Hh,
                                                                      L * Dh)

    o2 = attention_core(to_heads(q), to_heads(k), to_heads(v), L=L, D=Dh)
    o = o2.reshape(Nn, Hh, L, Dh).transpose(2, 0, 1, 3).reshape(L * Nn, E)
    return matmul_bias_act(o.astype(jnp.bfloat16), p["w_out"], p["b_out"],
                           res=res_rows, act=None)


def transformer_module(p, x):
    # x: (B, 8, 8, 1024) NHWC (== the reference (B,1024,8,8) with C moved last).
    B, Hs, Ws, Emb = x.shape
    x1 = layernorm_w(x, p["ln1_g"], p["ln1_b"])
    x_rows = x.reshape(B * Hs * Ws, Emb)
    x1_rows = x1.reshape(B * Hs * Ws, Emb)
    # nn.MultiheadAttention(batch_first=False) on (B, 64, 1024): L=B, N=64.
    x = multihead_attention(p["mha"], x1_rows, x_rows, L=B, Nn=Hs * Ws,
                            E=Emb).reshape(B, Hs, Ws, Emb)
    x2 = layernorm_w(x, p["ln2_g"], p["ln2_b"])
    mlp = p["mlp"]
    h = matmul_bias_act(x2.reshape(B, -1), mlp["w1_q"], mlp["b1"],
                        scale=mlp["w1_s"], act="relu")
    h = matmul_bias_act(h, mlp["w2"], mlp["b2"], act="relu")
    x = matmul_bias_act(h, mlp["w3_q"], mlp["b3"], scale=mlp["w3_s"],
                        res=x.reshape(B, -1), act=None).reshape(B, Hs, Ws, Emb)
    return x


def transformer_forward(layers, x):
    for lp in layers:
        x = transformer_module(lp, x)
    return x


# --------------------------------------------------------------------------
# Deterministic parameter construction + one-time eval-mode folding
# --------------------------------------------------------------------------
class KeyGen:
    def __init__(self, seed):
        self._key = jax.random.PRNGKey(seed)

    def __call__(self):
        self._key, k = jax.random.split(self._key)
        return k


def _make_conv(kg, kh, kw, cin, cout):
    std = math.sqrt(2.0 / (kh * kw * cin))
    return std * jax.random.normal(kg(), (kh, kw, cin, cout), jnp.float32)


def _make_bn(kg, c):
    return dict(
        gamma=1.0 + 0.05 * jax.random.normal(kg(), (c,), jnp.float32),
        beta=0.05 * jax.random.normal(kg(), (c,), jnp.float32),
        mean=0.05 * jax.random.normal(kg(), (c,), jnp.float32),
        var=jax.random.uniform(kg(), (c,), jnp.float32, 0.9, 1.1),
    )


def _make_block(kg, cin, cout, stride):
    p = dict(conv1=_make_conv(kg, 3, 3, cin, cout), bn1=_make_bn(kg, cout),
             conv2=_make_conv(kg, 3, 3, cout, cout), bn2=_make_bn(kg, cout))
    if stride != 1 or cin != cout:
        p["down_conv"] = _make_conv(kg, 1, 1, cin, cout)
        p["down_bn"] = _make_bn(kg, cout)
    return p


def _make_layer_params(kg, cin, cout, stride):
    return [_make_block(kg, cin, cout, stride), _make_block(kg, cout, cout, 1)]


def _make_resnet18(kg, in_ch, with_stem):
    p = {}
    c1_in = in_ch
    if with_stem:
        p["stem_conv"] = _make_conv(kg, 3, 3, in_ch, 64)
        p["stem_bn"] = _make_bn(kg, 64)
        c1_in = 64
    p["conv1"] = _make_conv(kg, 7, 7, c1_in, 64)
    p["bn1"] = _make_bn(kg, 64)
    p["layer1"] = _make_layer_params(kg, 64, 64, 1)
    p["layer2"] = _make_layer_params(kg, 64, 128, 2)
    p["layer3"] = _make_layer_params(kg, 128, 256, 2)
    p["layer4"] = _make_layer_params(kg, 256, 512, 2)
    return p


def _make_linear(kg, fin, fout):
    bound = 1.0 / math.sqrt(fin)
    w = jax.random.uniform(kg(), (fin, fout), jnp.float32, -bound, bound)
    b = jax.random.uniform(kg(), (fout,), jnp.float32, -bound, bound)
    return w, b


def _make_transformer_layer(kg, emb, hs, heads):
    bound = math.sqrt(6.0 / (emb + 3 * emb))
    w_in = jax.random.uniform(kg(), (emb, 3 * emb), jnp.float32, -bound, bound)
    b_in = jnp.zeros((3 * emb,), jnp.float32)
    w_out, b_out = _make_linear(kg, emb, emb)
    flat = emb * hs * hs
    w1, b1 = _make_linear(kg, flat, 128)
    w2, b2 = _make_linear(kg, 128, 128)
    w3, b3 = _make_linear(kg, 128, flat)
    return dict(
        ln1_g=jnp.ones((hs,), jnp.float32), ln1_b=jnp.zeros((hs,), jnp.float32),
        ln2_g=jnp.ones((hs,), jnp.float32), ln2_b=jnp.zeros((hs,), jnp.float32),
        mha=dict(num_heads=heads, w_in=w_in, b_in=b_in, w_out=w_out, b_out=b_out),
        mlp=dict(w1=w1, b1=b1, w2=w2, b2=b2, w3=w3, b3=b3),
    )


def _make_basic_conv(kg, cin, cout):
    return dict(w=_make_conv(kg, 3, 3, cin, cout), bn=_make_bn(kg, cout))


def init_params(seed=0, n_layers=4):
    kg = KeyGen(seed)
    return dict(
        bg=_make_resnet18(kg, 4, with_stem=False),
        fg=_make_resnet18(kg, 4, with_stem=True),
        transformer=[_make_transformer_layer(kg, 1024, 8, 8)
                     for _ in range(n_layers)],
        upconv32=_make_basic_conv(kg, 1024, 512),
        upconv16=_make_basic_conv(kg, 512, 256),
        upconv8=_make_basic_conv(kg, 256, 128),
        upconv4=_make_basic_conv(kg, 128, 64),
        upconv2=_make_basic_conv(kg, 64, 64),
        upconv1=_make_basic_conv(kg, 64, 64),
        # ConvTranspose2d(64,512,3,s=1,p=1) == 3x3 'same' conv; weights are
        # synthetic so the equivalent forward conv is parameterized directly.
        deconv_w=_make_conv(kg, 3, 3, 64, 512),
        deconv_b=0.05 * jax.random.normal(kg(), (512,), jnp.float32),
        cls_w=_make_conv(kg, 1, 1, 512, 2),
        cls_b=0.05 * jax.random.normal(kg(), (2,), jnp.float32),
    )


def _fold_cb(w, bn):
    scale = bn["gamma"] * jax.lax.rsqrt(bn["var"] + 1e-5)
    shift = bn["beta"] - bn["mean"] * scale
    return {"w": (w * scale[None, None, None, :]).astype(jnp.bfloat16),
            "b": shift.astype(jnp.float32)}


def _fold_block(bp):
    fb = {"conv1": _fold_cb(bp["conv1"], bp["bn1"]),
          "conv2": _fold_cb(bp["conv2"], bp["bn2"])}
    if "down_conv" in bp:
        fb["down"] = _fold_cb(bp["down_conv"], bp["down_bn"])
    return fb


def _fold_resnet(p):
    fp = {"conv1": _fold_cb(p["conv1"], p["bn1"])}
    if "stem_conv" in p:
        fp["stem"] = _fold_cb(p["stem_conv"], p["stem_bn"])
    for name in ("layer1", "layer2", "layer3", "layer4"):
        fp[name] = [_fold_block(b) for b in p[name]]
    return fp


def _quant_int8(w):
    """Per-output-column symmetric int8 quantization of a (K, N) weight."""
    amax = jnp.max(jnp.abs(w), axis=0)
    scale = jnp.maximum(amax, 1e-8) / 127.0
    q = jnp.clip(jnp.round(w / scale[None, :]), -127, 127).astype(jnp.int8)
    return q, scale.astype(jnp.float32)


def _fold_tlayer(tp):
    mha, mlp = tp["mha"], tp["mlp"]
    w1_q, w1_s = _quant_int8(mlp["w1"])
    w3_q, w3_s = _quant_int8(mlp["w3"])
    return dict(
        ln1_g=tp["ln1_g"], ln1_b=tp["ln1_b"],
        ln2_g=tp["ln2_g"], ln2_b=tp["ln2_b"],
        mha=dict(num_heads=mha["num_heads"],
                 w_in=mha["w_in"].astype(jnp.bfloat16), b_in=mha["b_in"],
                 w_out=mha["w_out"].astype(jnp.bfloat16), b_out=mha["b_out"]),
        mlp=dict(w1_q=w1_q, w1_s=w1_s, b1=mlp["b1"],
                 w2=mlp["w2"].astype(jnp.bfloat16), b2=mlp["b2"],
                 w3_q=w3_q, w3_s=w3_s, b3=mlp["b3"]),
    )


def fold_params(params):
    """One-time eval prep: fold BN, quantize MLP weights, fold classifier
    into the deconv weights (1x1 cls o 3x3 deconv == 3x3 conv)."""
    cls_w2 = params["cls_w"].reshape(512, 2)
    cls_fold_w = jnp.einsum("hwcs,se->hwce", params["deconv_w"], cls_w2)
    cls_fold_b = params["deconv_b"] @ cls_w2 + params["cls_b"]
    return dict(
        bg=_fold_resnet(params["bg"]),
        fg=_fold_resnet(params["fg"]),
        transformer=[_fold_tlayer(t) for t in params["transformer"]],
        upconv32=_fold_cb(params["upconv32"]["w"], params["upconv32"]["bn"]),
        upconv16=_fold_cb(params["upconv16"]["w"], params["upconv16"]["bn"]),
        upconv8=_fold_cb(params["upconv8"]["w"], params["upconv8"]["bn"]),
        upconv4=_fold_cb(params["upconv4"]["w"], params["upconv4"]["bn"]),
        upconv2=_fold_cb(params["upconv2"]["w"], params["upconv2"]["bn"]),
        upconv1=_fold_cb(params["upconv1"]["w"], params["upconv1"]["bn"]),
        deconv={"w": params["deconv_w"].astype(jnp.bfloat16),
                "b": params["deconv_b"].astype(jnp.float32)},
        cls_fold={"w": cls_fold_w.astype(jnp.bfloat16),
                  "b": cls_fold_b.astype(jnp.float32)},
    )


# --------------------------------------------------------------------------
# Full ObPlaNet_resnet18 forward (mode='val' path of the reference)
# --------------------------------------------------------------------------
def obplanet_forward(fp, bg_in_data, fg_in_data, mask_in_data):
    """Inputs NCHW (PyTorch convention); returns (out_data, fuse_out) NCHW f32."""
    bg = jnp.transpose(bg_in_data, (0, 2, 3, 1)).astype(jnp.bfloat16)
    fg = jnp.transpose(fg_in_data, (0, 2, 3, 1)).astype(jnp.bfloat16)
    mask = jnp.transpose(mask_in_data, (0, 2, 3, 1)).astype(jnp.bfloat16)
    black_mask = jnp.zeros_like(mask)
    bg_in = jnp.concatenate([bg, black_mask], axis=-1)
    fg_in = jnp.concatenate([fg, mask], axis=-1)

    pbg, pfg = fp["bg"], fp["fg"]
    # bg encoders (5 scales)
    b1 = conv_block(bg_in, pbg["conv1"], 2, 3, act="relu")
    b2 = run_layer(maxpool_3x3_s2_p1(b1), pbg["layer1"], 1)
    b4 = run_layer(b2, pbg["layer2"], 2)
    b8 = run_layer(b4, pbg["layer3"], 2)
    b16 = run_layer(b8, pbg["layer4"], 2)
    # fg encoders (6 scales)
    f1 = conv_block(fg_in, pfg["stem"], 1, 1, act="relu")
    f2 = conv_block(f1, pfg["conv1"], 2, 3, act="relu")
    f4 = run_layer(maxpool_3x3_s2_p1(f2), pfg["layer1"], 1)
    f8 = run_layer(f4, pfg["layer2"], 2)
    f16 = run_layer(f8, pfg["layer3"], 2)
    f32s = run_layer(f16, pfg["layer4"], 2)

    # Transformer on cat(bg_final, fg_final), kept NHWC (no big transposes).
    t_in = jnp.concatenate([b16, f32s], axis=-1)       # (B, 8, 8, 1024)
    t_out = transformer_forward(fp["transformer"], t_in)

    d16 = conv_block(t_out, fp["upconv32"], 1, 1, act="relu")
    d8 = upsample_add(conv_block(d16, fp["upconv16"], 1, 1, act="relu"), b8)
    d4 = upsample_add(conv_block(d8, fp["upconv8"], 1, 1, act="relu"), b4)
    d2 = upsample_add(conv_block(d4, fp["upconv4"], 1, 1, act="relu"), b2)
    d1 = upsample_add(conv_block(d2, fp["upconv2"], 1, 1, act="relu"), b1)
    bg_out = conv_block(cus_sample_scale2(d1), fp["upconv1"], 1, 1, act="relu")

    # deconv (3x3 same conv) via the im2col matmul path: a single K=576 dot
    # per output tile instead of 9 K=64 VMEM-accumulated taps.
    fuse_out = conv2d(bg_out, fp["deconv"]["w"], fp["deconv"]["b"],
                      stride=1, pad=1, act=None, out_dtype=jnp.float32)
    # classifier folded into the deconv weights: never re-reads fuse_out.
    out_data = conv3x3_s1(bg_out, fp["cls_fold"]["w"], fp["cls_fold"]["b"],
                          act=None, out_dtype=jnp.float32)
    return (jnp.transpose(out_data, (0, 3, 1, 2)),
            jnp.transpose(fuse_out, (0, 3, 1, 2)))


if __name__ == "__main__":
    # Spatial size 256 is forced by the hard-coded 1024x8x8 Transformer MLP
    # (256 / 32 = 8); batch kept small (2).
    B, H, W = 2, 256, 256
    params = init_params(seed=0)
    fparams = fold_params(params)

    k_bg, k_fg, k_mask = jax.random.split(jax.random.PRNGKey(0), 3)
    bg_in_data = jax.random.normal(k_bg, (B, 3, H, W), jnp.float32)
    fg_in_data = jax.random.normal(k_fg, (B, 3, H, W), jnp.float32)
    mask_in_data = (jax.random.uniform(k_mask, (B, 1, H, W)) > 0.5).astype(
        jnp.float32)

    out_data, fuse_out = obplanet_forward(fparams, bg_in_data, fg_in_data,
                                          mask_in_data)
    jax.block_until_ready((out_data, fuse_out))
    assert out_data.shape == (B, 2, H, W)
    assert fuse_out.shape == (B, 512, H, W)
    assert out_data.dtype == jnp.float32 and fuse_out.dtype == jnp.float32
    print("KERNEL_OK")
</pallas_src>

<mosaic_0001>
module attributes {stable_mosaic.version = 11 : i64} {
  func.func @_mm_kernel(%arg0: i32, %arg1: i32, %arg2: i32, %arg3: memref<512x256xbf16, #tpu.memory_space<vmem>>, %arg4: memref<256x64xbf16, #tpu.memory_space<vmem>>, %arg5: memref<1x64xf32, #tpu.memory_space<vmem>>, %arg6: memref<512x64xbf16, #tpu.memory_space<vmem>>) attributes {dimension_semantics = [#tpu.dimension_semantics<parallel>, #tpu.dimension_semantics<parallel>, #tpu.dimension_semantics<arbitrary>], iteration_bounds = array<i64: 64, 1, 1>, scalar_prefetch = 0 : i64, scratch_operands = 0 : i64, tpu.core_type = #tpu.core_type<tc>, window_params = [{transform_indices = @transform_0, window_bounds = array<i64: 512, 256>}, {transform_indices = @transform_1, window_bounds = array<i64: 256, 64>}, {transform_indices = @transform_2, window_bounds = array<i64: 1, 64>}, {transform_indices = @transform_3, window_bounds = array<i64: 512, 64>}]} {
    %c0 = arith.constant 0 : index
    %c0_0 = arith.constant 0 : index
    %0 = vector.load %arg4[%c0, %c0_0] : memref<256x64xbf16, #tpu.memory_space<vmem>>, vector<256x64xbf16>
    %c0_1 = arith.constant 0 : index
    %c0_2 = arith.constant 0 : index
    %1 = vector.load %arg3[%c0_1, %c0_2] : memref<512x256xbf16, #tpu.memory_space<vmem>>, vector<512x256xbf16>
    %cst = arith.constant dense<0.000000e+00> : vector<512x64xf32>
    %2 = tpu.matmul %1, %0, %cst {dimension_numbers = #tpu.dot_dimension_numbers<[1], [0], [0], [1], [0, 0, 1, 1], [], []>} : vector<512x256xbf16>, vector<256x64xbf16>, vector<512x64xf32> -> vector<512x64xf32>
    %c0_3 = arith.constant 0 : index
    %c0_4 = arith.constant 0 : index
    %3 = vector.load %arg5[%c0_3, %c0_4] : memref<1x64xf32, #tpu.memory_space<vmem>>, vector<1x64xf32>
    %4 = vector.broadcast %3 : vector<1x64xf32> to vector<512x64xf32>
    %5 = arith.addf %2, %4 : vector<512x64xf32>
    %cst_5 = arith.constant 0.000000e+00 : f32
    %6 = vector.broadcast %cst_5 : f32 to vector<512x64xf32>
    %7 = arith.maximumf %5, %6 : vector<512x64xf32>
    %8 = arith.truncf %7 : vector<512x64xf32> to vector<512x64xbf16>
    %c0_6 = arith.constant 0 : index
    %c0_7 = arith.constant 0 : index
    %9 = vector.load %arg6[%c0_6, %c0_7] : memref<512x64xbf16, #tpu.memory_space<vmem>>, vector<512x64xbf16>
    tpu.vector_store %arg6[%c0_6, %c0_7], %8 {strides = array<i32>} : memref<512x64xbf16, #tpu.memory_space<vmem>>, vector<512x64xbf16>,
    return
  }
  func.func @transform_0(%arg0: i32, %arg1: i32, %arg2: i32) -> (i32, i32) {
    %c0_i32 = arith.constant 0 : i32
    return %arg0, %arg2 : i32, i32
  }
  func.func @transform_1(%arg0: i32, %arg1: i32, %arg2: i32) -> (i32, i32) {
    %c0_i32 = arith.constant 0 : i32
    return %arg2, %arg1 : i32, i32
  }
  func.func @transform_2(%arg0: i32, %arg1: i32, %arg2: i32) -> (i32, i32) {
    %c0_i32 = arith.constant 0 : i32
    %c0_i32_0 = arith.constant 0 : i32
    return %c0_i32, %arg1 : i32, i32
  }
  func.func @transform_3(%arg0: i32, %arg1: i32, %arg2: i32) -> (i32, i32) {
    %c0_i32 = arith.constant 0 : i32
    return %arg0, %arg1 : i32, i32
  }
}

</mosaic_0001>

<bundles_post_ra>
// kernel: matmul_bias_act.1
= control target key start
LH: loop header
LB: loop body
LE: loop exit
PB: predicated region body
PF: predicated region fallthrough
CT: control target
= control target key end

     0   :  { %8 = vsyncpa [#allocation3], 0  ;;  %s2692_s0 = inlined_call_operand.vmem [shape: bf16[32768,256], index: 0, kind: input, shape index: {}]   ;;  %s2693_s1 = inlined_call_operand.hbm [shape: bf16[256,64], index: 1, kind: input, shape index: {}]   ;;  %s2694_s2 = inlined_call_operand.hbm [shape: f32[1,64], index: 2, kind: input, shape index: {}]   ;;  %s2695_s3 = inlined_call_operand.hbm [shape: bf16[32768,64], index: 3, kind: output, shape index: {}]  }
   0x1   :  { %9 = vsyncpa [#allocation6], 0 }
   0x2   :  { %10 = vsyncpa [#allocation4], 0 }
   0x3   :  { %12 = vsyncpa [#allocation4 + $0x1], 0  ;;  %s2203_s12 = smov 0   ;;  %s2205_s13 = smov 0  }
   0x4   :  { %s2207_s14 = smov 0   ;;  %s2209_s15 = smov 0  }
   0x5   :  { %s2211_s16 = smov 0   ;;  %s2213_s17 = smov 0  }
   0x6 LB: > { %s1577_s18 = sadd.s32 4294967295, %s2173_s17   ;;  %s1578_s19 = sadd.s32 4294967294, %s2173_s17   ;;  %s2173_s17 = sphi %s2213_s17, %s18_s17   ;;  %s2169_s16 = sphi %s2211_s16, %s2713_s16   ;;  %s2165_s15 = sphi %s2209_s15, %s2712_s15   ;;  %s2161_s14 = sphi %s2207_s14, %s2711_s14   ;;  %s2157_s13 = sphi %s2205_s13, %s2710_s13   ;;  %s2153_s12 = sphi %s2203_s12, %s2709_s12  }
   0x7   : > { %s37_s20 = sadd.s32 1, %s2169_s16  ;;  %s128_s21 = sadd.s32 1, %s2161_s14 }
   0x8   : > { %p39_p0 = scmp.ge.s32.totalorder %s37_s20, 64  ;;  %p138_p1 = scmp.ne.s32.totalorder %s2161_s14, %s2157_s13 }
   0x9   : > { %p139_p2 = scmp.eq.s32.totalorder %s1577_s18, 63  ;;  %p144_p3 = scmp.ne.s32.totalorder %s2157_s13, %s2153_s12 }
   0xa   : > { %s2715_s20 = smov (%p39_p0, %s37_s20), 0  ;;  %p145_p5 = scmp.eq.s32.totalorder %s1578_s19, 63 }
   0xb   : > { %p2243_p4 = por %p139_p2, %p138_p1  ;;  %s123_s23 = ssub.s32 %s2169_s16, %s2715_s20 }
   0xc   : > { %p1579_p6 = scmp.ge.s32.totalorder %s2173_s17, 1  ;;  %p126_p7 = scmp.eq.s32.totalorder %s123_s23, 0 }
   0xd   : > { %s2700_s22 = scalar_select %p2243_p4, 1, 0 }
   0xe   : > { %p2250_p8 = por %p145_p5, %p144_p3  ;;  %p152_p9 = scmp.lt.s32.totalorder %s2173_s17, 65 }
   0xf   : > { %s2256_s25 = scalar_select %p126_p7, %s2161_s14, %s128_s21  }
  0x10   : > { %s2701_s24 = scalar_select %p2250_p8, 1, 0 }
  0x11   : > { %p2258_p10 = pnand %p1579_p6, %p152_p9  ;;  %p2262_p11 = scmp.eq.s32.totalorder %s1577_s18, 0 }
  0x12   : > { %s2175_s28 = smov [#allocation2]   ;;  %s2176_s4 = smov [#allocation5]  }
  0x13   : > { %s2702_s26 = scalar_select %p2258_p10, 1, 0 }
  0x14   : > { %s2703_s27 = scalar_select %p2262_p11, 1, 0 }
  0x15   : > { %p1848_p12 = pneg %p2258_p10  ;;  %s168_s29 = sshll.u32 %s2175_s28, 4  ;;  %s169_s29 = int_to_ptr.vmem [resolvable:$true] %s168_s29 }
  0x16   : > { %s184_s5 = sshll.u32 %s2176_s4, 4  ;;  %s2031_s8 = scalar_lea.hbm %s2693_s1, 2048  ;;  %s2274_s5 = int_to_ptr.vmem [resolvable:$true] %s184_s5 }
  0x17   : > { %p2270_p13 = pnand %p2262_p11, %p1848_p12  ;;  %p2032_p0 = scmp.ne.s32.totalorder %s2693_s1, %s2031_s8 }
  0x18   : > { %p2038_p5 = scmp.lt.u32.totalorder %s2031_s8, %s2693_s1 }
  0x19   : > { %p2033_p1 = pneg %p2270_p13 }
  0x1b   : > { %p2034_p2 = pnand %p2033_p1, %p2032_p0 }
  0x1d   : > { %p2035_p3 = pneg %p2034_p2 }
  0x1f   : > { %p2040_p6 = pnand %p2038_p5, %p2035_p3 }
  0x21   : > { %2043 = shalt.err (!%p2040_p6)
}
  0x22   : > { %s2044_s19 = scalar_lea.vmem %s169_s29, 2048  ;;  %p2052_p8 = scmp.lt.s32.totalorder %s169_s29, %s169_s29 }
  0x23   : > { %p2045_p7 = scmp.ne.s32.totalorder %s169_s29, %s2044_s19  ;;  %p2053_p4 = scmp.lt.s32.totalorder %s2044_s19, %s2044_s19 }
  0x25   : > { %p2047_p9 = pnand %p2045_p7, %p2033_p1  ;;  %p2054_p11 = por %p2053_p4, %p2052_p8 }
  0x27   : > { %p2048_p12 = pneg %p2047_p9 }
  0x29   : > { %p2055_p10 = pnand %p2054_p11, %p2048_p12 }
  0x2b   : > { %2058 = shalt.err (!%p2055_p10)
}
  0x2c   : > { %s2177_s21 = smov 64   ;;  %s2178_s23 = smov 4  }
  0x2d   : > { %1851 = dma.hbm_to_vmem [thread:$0]  (!%p2270_p13), %s2693_s1, 2048, %s169_s29, [#allocation3], %s2177_s21, %s2177_s21, %s2178_s23  }
  0x2e   : > { %s2059_s8 = scalar_lea.hbm %s2694_s2, 16 }
  0x2f   : > { %p2060_p0 = scmp.ne.s32.totalorder %s2694_s2, %s2059_s8  ;;  %p2066_p10 = scmp.lt.u32.totalorder %s2059_s8, %s2694_s2 }
  0x31   : > { %p2062_p4 = pnand %p2060_p0, %p2033_p1 }
  0x33   : > { %p2063_p8 = pneg %p2062_p4 }
  0x35   : > { %p2068_p11 = pnand %p2066_p10, %p2063_p8 }
  0x37   : > { %2071 = shalt.err (!%p2068_p11)
}
  0x38   : > { %s2072_s29 = scalar_lea.vmem %s2274_s5, 16  ;;  %s2079_s19 = scalar_lea.vmem %s2274_s5, 32 }
  0x39   : > { %p2073_p2 = scmp.ne.s32.totalorder %s2274_s5, %s2072_s29  ;;  %p2080_p6 = scmp.lt.s32.totalorder %s2274_s5, %s2274_s5 }
  0x3a   : > { %p2081_p7 = scmp.lt.s32.totalorder %s2079_s19, %s2072_s29 }
  0x3b   : > { %p2075_p3 = pnand %p2073_p2, %p2033_p1 }
  0x3c   : > { %p2082_p9 = por %p2081_p7, %p2080_p6 }
  0x3d   : > { %p2076_p5 = pneg %p2075_p3 }
  0x3f   : > { %p2083_p12 = pnand %p2082_p9, %p2076_p5 }
  0x41   : > { %2086 = shalt.err (!%p2083_p12)
}
  0x42   : > { %1854 = dma.hbm_to_vmem [thread:$0]  (!%p2270_p13), %s2694_s2, 16, %s2274_s5, [#allocation6]  }
  0x43   : > { %p2705_p0 = scmp.ne.s32.totalorder %s2702_s26, 0 }
  0x44   : > { %p2706_p1 = scmp.ne.s32.totalorder (!%p2705_p0), %s2703_s27, 0 }
  0x45   : > { %212 = sbr.rel (%p2705_p0) target bundleno = 499 (0x1f3), region = 32 }
  0x4c   : > { %2140 = dma.done.wait (%p2706_p1), [#allocation3], 2048  }
  0x4d   : > { %2142 = vsyncadd (%p2706_p1), [#allocation3], 4294965248 }
  0x4e   : > { %2144 = dma.done.wait (%p2706_p1), [#allocation6], 16  }
  0x4f   : > { %2146 = vsyncadd (%p2706_p1), [#allocation6], 4294967280  ;;  %v2179_v0 = vmov 0   ;;  %v1919_v1 = vld [vmem:[#allocation2] sm:$0xff]   ;;  %s1587_s26 = sshll.u32 %s2165_s15, 6  ;;  %v1920_v2 = vld [vmem:[#allocation2 + $0x8] sm:$0xff]  }
  0x50   : > { %779 = vmatprep.subr.bf16.mxu0 %v2179_v0  ;;  %1806 = vmatprep.subr.bf16.mxu1 %v2179_v0  ;;  %p247_p13 = scmp.lt.s32.totalorder %s1587_s26, 4095  ;;  %v1921_v3 = vld [vmem:[#allocation2 + $0x10] sm:$0xff]   ;;  %v1922_v4 = vld [vmem:[#allocation2 + $0x18] sm:$0xff]   ;;  %v1923_v5 = vld [vmem:[#allocation2 + $0x20] sm:$0xff]   ;;  %s242_s4 = sand.u32 1, %s2157_s13   ;;  %vm1388_vm0 = vcmask 519168  }
  0x51   : > { %780 = vmatpush1.bf16.msra.mxu0 %v1919_v1  ;;  %1822 = vmatpush1.bf16.msra.mxu1 %v1919_v1  ;;  %v1924_v7 = vld [vmem:[#allocation2 + $0x28] sm:$0xff]   ;;  %v1925_v9 = vld [vmem:[#allocation2 + $0x30] sm:$0xff]   ;;  %v1926_v10 = vld [vmem:[#allocation2 + $0x38] sm:$0xff]   ;;  %s1586_s6 = sshll.u32 %s242_s4, 8  ;;  %s1805_s8 = sshll.u32 %s2165_s15, 12 }
  0x52   : > { %781 = vmatprep.subr.bf16.mxu0 %v2179_v0  ;;  %1807 = vmatprep.subr.bf16.mxu1 %v2179_v0  ;;  %s2717_s26 = smov (!%p247_p13, %s1587_s26), 4095  ;;  %v1927_v11 = vld [vmem:[#allocation2 + $0x40] sm:$0xff]   ;;  %v1928_v12 = vld [vmem:[#allocation2 + $0x48] sm:$0xff]   ;;  %v1929_v13 = vld [vmem:[#allocation2 + $0x50] sm:$0xff]   ;;  %s2445_s7 = scalar_lea.vmem [#allocation7], %s1586_s6 }
  0x53   : > { %s1740_s27 = sshll.u32 %s2717_s26, 3  ;;  %v1930_v14 = vld [vmem:[#allocation2 + $0x58] sm:$0xff]   ;;  %v1931_v15 = vld [vmem:[#allocation2 + $0x60] sm:$0xff]   ;;  %v1932_v16 = vld [vmem:[#allocation2 + $0x68] sm:$0xff]   ;;  %s1468_s9 = sshll.u32 %s2445_s7, 4  ;;  %s2634_s9 = int_to_ptr.vmem [resolvable:$true] %s1468_s9 }
  0x54   : > { %s2346_s28 = scalar_lea.vmem %s2692_s0, %s1740_s27  ;;  %v1933_v17 = vld [vmem:[#allocation2 + $0x70] sm:$0xff]   ;;  %v1934_v18 = vld [vmem:[#allocation2 + $0x78] sm:$0xff]   ;;  %s2632_s18 = scalar_lea.hbm %s2695_s3, %s1805_s8 }
  0x55   : > { %782 = vmatpush1.bf16.msra.mxu0 %v1920_v2  ;;  %1823 = vmatpush1.bf16.msra.mxu1 %v1920_v2  ;;  %v1937_v6 = vld [vmem:[%s2346_s28 + $0x4] ss:$8 sps:$4 sm:$0xff]   ;;  %v1935_v19 = vld [vmem:[%s2346_s28] ss:$8 sps:$4 sm:$0xff]   ;;  %v1941_v21 = vld [vmem:[%s2346_s28 + $0x14] ss:$8 sps:$4 sm:$0xff]  }
  0x56   : > { %783 = vmatprep.subr.bf16.mxu0 %v2179_v0  ;;  %1808 = vmatprep.subr.bf16.mxu1 %v2179_v0  ;;  %v1940_v8 = vld [vmem:[%s2346_s28 + $0x104] ss:$8 sps:$4 sm:$0xff]   ;;  %v1938_v20 = vld [vmem:[%s2346_s28 + $0x100] ss:$8 sps:$4 sm:$0xff]   ;;  %v1943_v22 = vld [vmem:[%s2346_s28 + $0x114] ss:$8 sps:$4 sm:$0xff]  }
  0x57   : > { %811 = vmatprep.mubr.bf16.mxu0 %v1937_v6  ;;  %939 = vmatprep.mubr.bf16.mxu1 %v1940_v8  ;;  %v1945_v23 = vld [vmem:[%s2346_s28 + $0x10] ss:$8 sps:$4 sm:$0xff]   ;;  %v1947_v25 = vld [vmem:[%s2346_s28 + $0x24] ss:$8 sps:$4 sm:$0xff]   ;;  %v1951_v27 = vld [vmem:[%s2346_s28 + $0x20] ss:$8 sps:$4 sm:$0xff]  }
  0x58   : > { %v1946_v24 = vld [vmem:[%s2346_s28 + $0x110] ss:$8 sps:$4 sm:$0xff]   ;;  %v1949_v26 = vld [vmem:[%s2346_s28 + $0x124] ss:$8 sps:$4 sm:$0xff]   ;;  %v1952_v28 = vld [vmem:[%s2346_s28 + $0x120] ss:$8 sps:$4 sm:$0xff]  }
  0x59   : > { %784 = vmatpush1.bf16.msra.mxu0 %v1921_v3  ;;  %1824 = vmatpush1.bf16.msra.mxu1 %v1921_v3  ;;  %v1953_v29 = vld [vmem:[%s2346_s28 + $0x34] ss:$8 sps:$4 sm:$0xff]   ;;  %v1957_v31 = vld [vmem:[%s2346_s28 + $0x30] ss:$8 sps:$4 sm:$0xff]   ;;  %v1959_v33 = vld [vmem:[%s2346_s28 + $0x44] ss:$8 sps:$4 sm:$0xff]  }
  0x5a   : > { %785 = vmatprep.subr.bf16.mxu0 %v2179_v0  ;;  %1809 = vmatprep.subr.bf16.mxu1 %v2179_v0  ;;  %v1955_v30 = vld [vmem:[%s2346_s28 + $0x134] ss:$8 sps:$4 sm:$0xff]   ;;  %v1958_v32 = vld [vmem:[%s2346_s28 + $0x130] ss:$8 sps:$4 sm:$0xff]   ;;  %v1961_v34 = vld [vmem:[%s2346_s28 + $0x144] ss:$8 sps:$4 sm:$0xff]  }
  0x5b   : > { %v1963_v35 = vld [vmem:[%s2346_s28 + $0x40] ss:$8 sps:$4 sm:$0xff]   ;;  %v1965_v37 = vld [vmem:[%s2346_s28 + $0x54] ss:$8 sps:$4 sm:$0xff]   ;;  %v1969_v39 = vld [vmem:[%s2346_s28 + $0x50] ss:$8 sps:$4 sm:$0xff]  }
  0x5c   : > { %v1964_v36 = vld [vmem:[%s2346_s28 + $0x140] ss:$8 sps:$4 sm:$0xff]   ;;  %v1967_v38 = vld [vmem:[%s2346_s28 + $0x154] ss:$8 sps:$4 sm:$0xff]   ;;  %v1970_v40 = vld [vmem:[%s2346_s28 + $0x150] ss:$8 sps:$4 sm:$0xff]  }
  0x5d   : > { %786 = vmatpush1.bf16.msra.mxu0 %v1922_v4  ;;  %1825 = vmatpush1.bf16.msra.mxu1 %v1922_v4  ;;  %v1971_v41 = vld [vmem:[%s2346_s28 + $0x64] ss:$8 sps:$4 sm:$0xff]   ;;  %v1975_v43 = vld [vmem:[%s2346_s28 + $0x60] ss:$8 sps:$4 sm:$0xff]   ;;  %v1977_v45 = vld [vmem:[%s2346_s28 + $0x74] ss:$8 sps:$4 sm:$0xff]  }
  0x5e   : > { %787 = vmatprep.subr.bf16.mxu0 %v2179_v0  ;;  %1810 = vmatprep.subr.bf16.mxu1 %v2179_v0  ;;  %v1973_v42 = vld [vmem:[%s2346_s28 + $0x164] ss:$8 sps:$4 sm:$0xff]   ;;  %v1976_v44 = vld [vmem:[%s2346_s28 + $0x160] ss:$8 sps:$4 sm:$0xff]   ;;  %v1979_v46 = vld [vmem:[%s2346_s28 + $0x174] ss:$8 sps:$4 sm:$0xff]  }
  0x5f   : > { %v1981_v47 = vld [vmem:[%s2346_s28 + $0x70] ss:$8 sps:$4 sm:$0xff]   ;;  %v1983_v49 = vld [vmem:[%s2346_s28 + $0x84] ss:$8 sps:$4 sm:$0xff]   ;;  %v1987_v51 = vld [vmem:[%s2346_s28 + $0x80] ss:$8 sps:$4 sm:$0xff]  }
  0x60   : > { %v1982_v48 = vld [vmem:[%s2346_s28 + $0x170] ss:$8 sps:$4 sm:$0xff]   ;;  %v1985_v50 = vld [vmem:[%s2346_s28 + $0x184] ss:$8 sps:$4 sm:$0xff]   ;;  %v1988_v52 = vld [vmem:[%s2346_s28 + $0x180] ss:$8 sps:$4 sm:$0xff]  }
  0x61   : > { %788 = vmatpush1.bf16.msra.mxu0 %v1923_v5  ;;  %1826 = vmatpush1.bf16.msra.mxu1 %v1923_v5  ;;  %v1989_v53 = vld [vmem:[%s2346_s28 + $0x94] ss:$8 sps:$4 sm:$0xff]   ;;  %v1993_v55 = vld [vmem:[%s2346_s28 + $0x90] ss:$8 sps:$4 sm:$0xff]   ;;  %v1995_v57 = vld [vmem:[%s2346_s28 + $0xa4] ss:$8 sps:$4 sm:$0xff]  }
  0x62   : > { %789 = vmatprep.subr.bf16.mxu0 %v2179_v0  ;;  %1811 = vmatprep.subr.bf16.mxu1 %v2179_v0  ;;  %v1991_v54 = vld [vmem:[%s2346_s28 + $0x194] ss:$8 sps:$4 sm:$0xff]   ;;  %v1994_v56 = vld [vmem:[%s2346_s28 + $0x190] ss:$8 sps:$4 sm:$0xff]   ;;  %v1997_v58 = vld [vmem:[%s2346_s28 + $0x1a4] ss:$8 sps:$4 sm:$0xff]  }
  0x63   : > { %v1999_v59 = vld [vmem:[%s2346_s28 + $0xa0] ss:$8 sps:$4 sm:$0xff]   ;;  %v2001_v61 = vld [vmem:[%s2346_s28 + $0xb4] ss:$8 sps:$4 sm:$0xff]   ;;  %v2005_v63 = vld [vmem:[%s2346_s28 + $0xb0] ss:$8 sps:$4 sm:$0xff]  }
  0x64   : > { %v2000_v60 = vld [vmem:[%s2346_s28 + $0x1a0] ss:$8 sps:$4 sm:$0xff]   ;;  %v2003_v62 = vld [vmem:[%s2346_s28 + $0x1b4] ss:$8 sps:$4 sm:$0xff]   ;;  %v2007_v1 = vld [vmem:[%s2346_s28 + $0xc4] ss:$8 sps:$4 sm:$0xff]  }
  0x65   : > { %790 = vmatpush1.bf16.msra.mxu0 %v1924_v7  ;;  %1827 = vmatpush1.bf16.msra.mxu1 %v1924_v7  ;;  %v2009_v2 = vld [vmem:[%s2346_s28 + $0x1c4] ss:$8 sps:$4 sm:$0xff]   ;;  %v2011_v3 = vld [vmem:[%s2346_s28 + $0xc0] ss:$8 sps:$4 sm:$0xff]   ;;  %v2013_v5 = vld [vmem:[%s2346_s28 + $0xd4] ss:$8 sps:$4 sm:$0xff]  }
  0x66   : > { %791 = vmatprep.subr.bf16.mxu0 %v2179_v0  ;;  %1812 = vmatprep.subr.bf16.mxu1 %v2179_v0  ;;  %v2012_v4 = vld [vmem:[%s2346_s28 + $0x1c0] ss:$8 sps:$4 sm:$0xff]   ;;  %v2015_v6 = vld [vmem:[%s2346_s28 + $0x1d4] ss:$8 sps:$4 sm:$0xff]   ;;  %v2017_v7 = vld [vmem:[%s2346_s28 + $0xd0] ss:$8 sps:$4 sm:$0xff]  }
  0x67   : > { %v2018_v8 = vld [vmem:[%s2346_s28 + $0x1d0] ss:$8 sps:$4 sm:$0xff]   ;;  %s2646_s15 = scalar_lea.sflag [#allocation4], %s242_s4  ;;  %s2087_s29 = scalar_lea.vmem %s2634_s9, 4096 }
  0x68   : > { %p2088_p4 = scmp.ne.s32.totalorder %s2634_s9, %s2087_s29  ;;  %p2707_p8 = scmp.ne.s32.totalorder %s2700_s22, 0 }
  0x69   : > { %792 = vmatpush1.bf16.msra.mxu0 %v1925_v9  ;;  %1828 = vmatpush1.bf16.msra.mxu1 %v1925_v9  ;;  %v2019_v9 = vld [vmem:[%s2346_s28 + $0xe4] ss:$8 sps:$4 sm:$0xff]   ;;  %s2180_s19 = smov [#allocation7]  }
  0x6a   : > { %793 = vmatprep.subr.bf16.mxu0 %v2179_v0  ;;  %1813 = vmatprep.subr.bf16.mxu1 %v2179_v0  ;;  %p2089_p10 = pnand %p2088_p4, %p2707_p8  ;;  %s2091_s21 = sshll.u32 %s2180_s19, 4  ;;  %s2092_s21 = int_to_ptr.vmem [resolvable:$false] %s2091_s21 }
  0x6b   : > { %s2093_s23 = scalar_lea.vmem %s2092_s21, 8192  ;;  %p2094_p2 = scmp.lt.s32.totalorder %s2634_s9, %s2092_s21 }
  0x6c   : > { %p2090_p11 = pneg %p2089_p10  ;;  %p2095_p3 = scmp.lt.s32.totalorder %s2093_s23, %s2087_s29 }
  0x6d   : > { %794 = vmatpush1.bf16.msra.mxu0 %v1926_v10  ;;  %1829 = vmatpush1.bf16.msra.mxu1 %v1926_v10  ;;  %v2021_v10 = vld [vmem:[%s2346_s28 + $0x1e4] ss:$8 sps:$4 sm:$0xff]  }
  0x6e   : > { %795 = vmatprep.subr.bf16.mxu0 %v2179_v0  ;;  %1814 = vmatprep.subr.bf16.mxu1 %v2179_v0  ;;  %p2096_p5 = por %p2095_p3, %p2094_p2 }
  0x70   : > { %p2097_p6 = pnand %p2096_p5, %p2090_p11 }
  0x71   : > { %796 = vmatpush1.bf16.msra.mxu0 %v1927_v11  ;;  %1830 = vmatpush1.bf16.msra.mxu1 %v1927_v11  ;;  %v2023_v11 = vld [vmem:[%s2346_s28 + $0xe0] ss:$8 sps:$4 sm:$0xff]  }
  0x72   : > { %797 = vmatprep.subr.bf16.mxu0 %v2179_v0  ;;  %1815 = vmatprep.subr.bf16.mxu1 %v2179_v0 }
  0x75   : > { %798 = vmatpush1.bf16.msra.mxu0 %v1928_v12  ;;  %1831 = vmatpush1.bf16.msra.mxu1 %v1928_v12  ;;  %v2024_v12 = vld [vmem:[%s2346_s28 + $0x1e0] ss:$8 sps:$4 sm:$0xff]  }
  0x76   : > { %799 = vmatprep.subr.bf16.mxu0 %v2179_v0  ;;  %1816 = vmatprep.subr.bf16.mxu1 %v2179_v0 }
  0x79   : > { %800 = vmatpush1.bf16.msra.mxu0 %v1929_v13  ;;  %1832 = vmatpush1.bf16.msra.mxu1 %v1929_v13  ;;  %v2025_v13 = vld [vmem:[%s2346_s28 + $0xf4] ss:$8 sps:$4 sm:$0xff]  }
  0x7a   : > { %801 = vmatprep.subr.bf16.mxu0 %v2179_v0  ;;  %1817 = vmatprep.subr.bf16.mxu1 %v2179_v0 }
  0x7d   : > { %802 = vmatpush1.bf16.msra.mxu0 %v1930_v14  ;;  %1833 = vmatpush1.bf16.msra.mxu1 %v1930_v14  ;;  %v2027_v14 = vld [vmem:[%s2346_s28 + $0x1f4] ss:$8 sps:$4 sm:$0xff]  }
  0x7e   : > { %803 = vmatprep.subr.bf16.mxu0 %v2179_v0  ;;  %1818 = vmatprep.subr.bf16.mxu1 %v2179_v0 }
  0x81   : > { %804 = vmatpush1.bf16.msra.mxu0 %v1931_v15  ;;  %1834 = vmatpush1.bf16.msra.mxu1 %v1931_v15  ;;  %v2029_v15 = vld [vmem:[%s2346_s28 + $0xf0] ss:$8 sps:$4 sm:$0xff]  }
  0x82   : > { %805 = vmatprep.subr.bf16.mxu0 %v2179_v0  ;;  %1819 = vmatprep.subr.bf16.mxu1 %v2179_v0 }
  0x85   : > { %806 = vmatpush1.bf16.msra.mxu0 %v1932_v16  ;;  %1835 = vmatpush1.bf16.msra.mxu1 %v1932_v16  ;;  %v2030_v16 = vld [vmem:[%s2346_s28 + $0x1f0] ss:$8 sps:$4 sm:$0xff]  }
  0x86   : > { %807 = vmatprep.subr.bf16.mxu0 %v2179_v0  ;;  %1820 = vmatprep.subr.bf16.mxu1 %v2179_v0 }
  0x89   : > { %808 = vmatpush1.bf16.msra.mxu0 %v1933_v17  ;;  %1836 = vmatpush1.bf16.msra.mxu1 %v1933_v17  ;;  %v2437_v17 = vld [vmem:[#allocation5] ss:$0 sm:$0xff] }
  0x8a   : > { %809 = vmatprep.subr.bf16.mxu0 %v2179_v0  ;;  %1821 = vmatprep.subr.bf16.mxu1 %v2179_v0  ;;  %v2006_v0 = vld [vmem:[%s2346_s28 + $0x1b0] ss:$8 sps:$4 sm:$0xff]  }
  0x8d   : > { %810 = vmatpush1.bf16.msra.mxu0 %v1934_v18  ;;  %1837 = vmatpush1.bf16.msra.mxu1 %v1934_v18 }
  0x90   : > { %812 = vmatmul.mubr.bf16.vlgmr.msra.gmra.mrb[0].mxu0 %v1935_v19  ;;  %940 = vmatmul.mubr.bf16.vlgmr.msra.gmra.mrb[0].mxu1 %v1938_v20 }
  0x91   : > { %819 = vmatprep.mubr.bf16.mxu0 %v1941_v21  ;;  %947 = vmatprep.mubr.bf16.mxu1 %v1943_v22 }
  0x98   : > { %820 = vmatmul.mubr.bf16.gmra.mrb[4].mxu0 %v1945_v23  ;;  %948 = vmatmul.mubr.bf16.gmra.mrb[4].mxu1 %v1946_v24 }
  0x99   : > { %827 = vmatprep.mubr.bf16.mxu0 %v1947_v25  ;;  %955 = vmatprep.mubr.bf16.mxu1 %v1949_v26 }
  0xa0   : > { %828 = vmatmul.mubr.bf16.gmra.mrb[8].mxu0 %v1951_v27  ;;  %956 = vmatmul.mubr.bf16.gmra.mrb[8].mxu1 %v1952_v28 }
  0xa1   : > { %835 = vmatprep.mubr.bf16.mxu0 %v1953_v29  ;;  %963 = vmatprep.mubr.bf16.mxu1 %v1955_v30 }
  0xa8   : > { %836 = vmatmul.mubr.bf16.gmra.mrb[12].mxu0 %v1957_v31  ;;  %964 = vmatmul.mubr.bf16.gmra.mrb[12].mxu1 %v1958_v32 }
  0xa9   : > { %843 = vmatprep.mubr.bf16.mxu0 %v1959_v33  ;;  %971 = vmatprep.mubr.bf16.mxu1 %v1961_v34 }
  0xb0   : > { %844 = vmatmul.mubr.bf16.gmra.mrb[16].mxu0 %v1963_v35  ;;  %972 = vmatmul.mubr.bf16.gmra.mrb[16].mxu1 %v1964_v36 }
  0xb1   : > { %851 = vmatprep.mubr.bf16.mxu0 %v1965_v37  ;;  %979 = vmatprep.mubr.bf16.mxu1 %v1967_v38 }
  0xb8   : > { %852 = vmatmul.mubr.bf16.gmra.mrb[20].mxu0 %v1969_v39  ;;  %980 = vmatmul.mubr.bf16.gmra.mrb[20].mxu1 %v1970_v40 }
  0xb9   : > { %859 = vmatprep.mubr.bf16.mxu0 %v1971_v41  ;;  %987 = vmatprep.mubr.bf16.mxu1 %v1973_v42 }
  0xc0   : > { %860 = vmatmul.mubr.bf16.gmra.mrb[24].mxu0 %v1975_v43  ;;  %988 = vmatmul.mubr.bf16.gmra.mrb[24].mxu1 %v1976_v44 }
  0xc1   : > { %867 = vmatprep.mubr.bf16.mxu0 %v1977_v45  ;;  %995 = vmatprep.mubr.bf16.mxu1 %v1979_v46 }
  0xc8   : > { %868 = vmatmul.mubr.bf16.gmra.mrb[28].mxu0 %v1981_v47  ;;  %996 = vmatmul.mubr.bf16.gmra.mrb[28].mxu1 %v1982_v48 }
  0xc9   : > { %875 = vmatprep.mubr.bf16.mxu0 %v1983_v49  ;;  %1003 = vmatprep.mubr.bf16.mxu1 %v1985_v50 }
  0xd0   : > { %876 = vmatmul.mubr.bf16.gmra.mrb[32].mxu0 %v1987_v51  ;;  %1004 = vmatmul.mubr.bf16.gmra.mrb[32].mxu1 %v1988_v52 }
  0xd1   : > { %883 = vmatprep.mubr.bf16.mxu0 %v1989_v53  ;;  %1011 = vmatprep.mubr.bf16.mxu1 %v1991_v54 }
  0xd8   : > { %884 = vmatmul.mubr.bf16.gmra.mrb[36].mxu0 %v1993_v55  ;;  %1012 = vmatmul.mubr.bf16.gmra.mrb[36].mxu1 %v1994_v56 }
  0xd9   : > { %891 = vmatprep.mubr.bf16.mxu0 %v1995_v57  ;;  %1019 = vmatprep.mubr.bf16.mxu1 %v1997_v58 }
  0xe0   : > { %892 = vmatmul.mubr.bf16.gmra.mrb[40].mxu0 %v1999_v59  ;;  %1020 = vmatmul.mubr.bf16.gmra.mrb[40].mxu1 %v2000_v60 }
  0xe1   : > { %899 = vmatprep.mubr.bf16.mxu0 %v2001_v61  ;;  %1027 = vmatprep.mubr.bf16.mxu1 %v2003_v62 }
  0xe8   : > { %900 = vmatmul.mubr.bf16.gmra.mrb[44].mxu0 %v2005_v63  ;;  %1028 = vmatmul.mubr.bf16.gmra.mrb[44].mxu1 %v2006_v0 }
  0xe9   : > { %907 = vmatprep.mubr.bf16.mxu0 %v2007_v1  ;;  %1035 = vmatprep.mubr.bf16.mxu1 %v2009_v2 }
  0xf0   : > { %908 = vmatmul.mubr.bf16.gmra.mrb[48].mxu0 %v2011_v3  ;;  %1036 = vmatmul.mubr.bf16.gmra.mrb[48].mxu1 %v2012_v4 }
  0xf1   : > { %915 = vmatprep.mubr.bf16.mxu0 %v2013_v5  ;;  %1043 = vmatprep.mubr.bf16.mxu1 %v2015_v6 }
  0xf8   : > { %916 = vmatmul.mubr.bf16.gmra.mrb[52].mxu0 %v2017_v7  ;;  %1044 = vmatmul.mubr.bf16.gmra.mrb[52].mxu1 %v2018_v8 }
  0xf9   : > { %923 = vmatprep.mubr.bf16.mxu0 %v2019_v9  ;;  %1051 = vmatprep.mubr.bf16.mxu1 %v2021_v10 }
 0x100   : > { %924 = vmatmul.mubr.bf16.gmra.mrb[56].mxu0 %v2023_v11  ;;  %1052 = vmatmul.mubr.bf16.gmra.mrb[56].mxu1 %v2024_v12 }
 0x101   : > { %931 = vmatprep.mubr.bf16.mxu0 %v2025_v13  ;;  %1059 = vmatprep.mubr.bf16.mxu1 %v2027_v14 }
 0x108   : > { %932 = vmatmul.mubr.bf16.gmra.mrb[60].mxu0 %v2029_v15  ;;  %1060 = vmatmul.mubr.bf16.gmra.mrb[60].mxu1 %v2030_v16 }
 0x163   : > { %v813_v18 = vpop.f32.mrb[0].mxu0  ;;  %v941_v19 = vpop.f32.mrb[0].mxu1 }
 0x164   : > { %v814_v20 = vadd.f32 %v2437_v17, %v813_v18  ;;  %v942_v21 = vadd.f32 %v2437_v17, %v941_v19  ;;  %v815_v22 = vpop.f32.mrb[1].mxu0  ;;  %v943_v23 = vpop.f32.mrb[1].mxu1 }
 0x165   : > { %v816_v24 = vpop.f32.mrb[2].mxu0  ;;  %v944_v25 = vpop.f32.mrb[2].mxu1 }
 0x166   : > { %v1068_v26 = vmax.f32 %v814_v20, 0.0  ;;  %v1100_v27 = vmax.f32 %v942_v21, 0.0  ;;  %v817_v28 = vadd.f32 %v2437_v17, %v816_v24  ;;  %v945_v29 = vadd.f32 %v2437_v17, %v944_v25  ;;  %v818_v30 = vpop.f32.mrb[3].mxu0  ;;  %v946_v31 = vpop.f32.mrb[3].mxu1 }
 0x168   : > { %v1741_v32 = vpack.c.bf16 %v1068_v26, %v1068_v26  ;;  %v1773_v33 = vpack.c.bf16 %v1100_v27, %v1100_v27  ;;  %v1069_v34 = vmax.f32 %v817_v28, 0.0  ;;  %v1101_v35 = vmax.f32 %v945_v29, 0.0 }
 0x16a   : > { %1389 = vst.msk [vmem:[%s2445_s7] sm:$0xf] %vm1388_vm0, %v1741_v32  ;;  %1421 = vst.msk [vmem:[%s2445_s7 + $0x80] sm:$0xf] %vm1388_vm0, %v1773_v33  ;;  %v1742_v36 = vpack.c.bf16 %v1069_v34, %v1069_v34  ;;  %v1774_v37 = vpack.c.bf16 %v1101_v35, %v1101_v35 }
 0x16b   : > { %v821_v38 = vpop.f32.mrb[4].mxu0  ;;  %v949_v39 = vpop.f32.mrb[4].mxu1 }
 0x16c   : > { %1390 = vst.msk [vmem:[%s2445_s7 + $0x4] sm:$0xf] %vm1388_vm0, %v1742_v36  ;;  %1422 = vst.msk [vmem:[%s2445_s7 + $0x84] sm:$0xf] %vm1388_vm0, %v1774_v37  ;;  %v822_v40 = vadd.f32 %v2437_v17, %v821_v38  ;;  %v950_v41 = vadd.f32 %v2437_v17, %v949_v39  ;;  %v823_v42 = vpop.f32.mrb[5].mxu0  ;;  %v951_v43 = vpop.f32.mrb[5].mxu1 }
 0x16d   : > { %v824_v44 = vpop.f32.mrb[6].mxu0  ;;  %v952_v45 = vpop.f32.mrb[6].mxu1 }
 0x16e   : > { %v1070_v46 = vmax.f32 %v822_v40, 0.0  ;;  %v1102_v47 = vmax.f32 %v950_v41, 0.0  ;;  %v825_v48 = vadd.f32 %v2437_v17, %v824_v44  ;;  %v953_v49 = vadd.f32 %v2437_v17, %v952_v45  ;;  %v826_v50 = vpop.f32.mrb[7].mxu0  ;;  %v954_v51 = vpop.f32.mrb[7].mxu1 }
 0x170   : > { %v1743_v52 = vpack.c.bf16 %v1070_v46, %v1070_v46  ;;  %v1775_v53 = vpack.c.bf16 %v1102_v47, %v1102_v47  ;;  %v1071_v54 = vmax.f32 %v825_v48, 0.0  ;;  %v1103_v55 = vmax.f32 %v953_v49, 0.0 }
 0x172   : > { %1391 = vst.msk [vmem:[%s2445_s7 + $0x8] sm:$0xf] %vm1388_vm0, %v1743_v52  ;;  %1423 = vst.msk [vmem:[%s2445_s7 + $0x88] sm:$0xf] %vm1388_vm0, %v1775_v53  ;;  %v1744_v56 = vpack.c.bf16 %v1071_v54, %v1071_v54  ;;  %v1776_v57 = vpack.c.bf16 %v1103_v55, %v1103_v55 }
 0x173   : > { %v829_v58 = vpop.f32.mrb[8].mxu0  ;;  %v957_v59 = vpop.f32.mrb[8].mxu1 }
 0x174   : > { %1392 = vst.msk [vmem:[%s2445_s7 + $0xc] sm:$0xf] %vm1388_vm0, %v1744_v56  ;;  %1424 = vst.msk [vmem:[%s2445_s7 + $0x8c] sm:$0xf] %vm1388_vm0, %v1776_v57  ;;  %v830_v60 = vadd.f32 %v2437_v17, %v829_v58  ;;  %v958_v61 = vadd.f32 %v2437_v17, %v957_v59  ;;  %v831_v62 = vpop.f32.mrb[9].mxu0  ;;  %v959_v63 = vpop.f32.mrb[9].mxu1 }
 0x175   : > { %v832_v0 = vpop.f32.mrb[10].mxu0  ;;  %v960_v1 = vpop.f32.mrb[10].mxu1 }
 0x176   : > { %v1072_v2 = vmax.f32 %v830_v60, 0.0  ;;  %v1104_v3 = vmax.f32 %v958_v61, 0.0  ;;  %v833_v4 = vadd.f32 %v2437_v17, %v832_v0  ;;  %v961_v5 = vadd.f32 %v2437_v17, %v960_v1  ;;  %v834_v6 = vpop.f32.mrb[11].mxu0  ;;  %v962_v7 = vpop.f32.mrb[11].mxu1 }
 0x178   : > { %v1745_v8 = vpack.c.bf16 %v1072_v2, %v1072_v2  ;;  %v1777_v9 = vpack.c.bf16 %v1104_v3, %v1104_v3  ;;  %v1073_v10 = vmax.f32 %v833_v4, 0.0  ;;  %v1105_v11 = vmax.f32 %v961_v5, 0.0 }
 0x17a   : > { %1393 = vst.msk [vmem:[%s2445_s7 + $0x10] sm:$0xf] %vm1388_vm0, %v1745_v8  ;;  %1425 = vst.msk [vmem:[%s2445_s7 + $0x90] sm:$0xf] %vm1388_vm0, %v1777_v9  ;;  %v1746_v12 = vpack.c.bf16 %v1073_v10, %v1073_v10  ;;  %v1778_v13 = vpack.c.bf16 %v1105_v11, %v1105_v11 }
 0x17b   : > { %v837_v14 = vpop.f32.mrb[12].mxu0  ;;  %v965_v15 = vpop.f32.mrb[12].mxu1 }
 0x17c   : > { %1394 = vst.msk [vmem:[%s2445_s7 + $0x14] sm:$0xf] %vm1388_vm0, %v1746_v12  ;;  %1426 = vst.msk [vmem:[%s2445_s7 + $0x94] sm:$0xf] %vm1388_vm0, %v1778_v13  ;;  %v838_v16 = vadd.f32 %v2437_v17, %v837_v14  ;;  %v966_v18 = vadd.f32 %v2437_v17, %v965_v15  ;;  %v839_v19 = vpop.f32.mrb[13].mxu0  ;;  %v967_v20 = vpop.f32.mrb[13].mxu1 }
 0x17d   : > { %v840_v21 = vpop.f32.mrb[14].mxu0  ;;  %v968_v22 = vpop.f32.mrb[14].mxu1 }
 0x17e   : > { %v1074_v23 = vmax.f32 %v838_v16, 0.0  ;;  %v1106_v24 = vmax.f32 %v966_v18, 0.0  ;;  %v841_v25 = vadd.f32 %v2437_v17, %v840_v21  ;;  %v969_v26 = vadd.f32 %v2437_v17, %v968_v22  ;;  %v842_v27 = vpop.f32.mrb[15].mxu0  ;;  %v970_v28 = vpop.f32.mrb[15].mxu1 }
 0x180   : > { %v1747_v29 = vpack.c.bf16 %v1074_v23, %v1074_v23  ;;  %v1779_v30 = vpack.c.bf16 %v1106_v24, %v1106_v24  ;;  %v1075_v31 = vmax.f32 %v841_v25, 0.0  ;;  %v1107_v32 = vmax.f32 %v969_v26, 0.0 }
 0x182   : > { %1395 = vst.msk [vmem:[%s2445_s7 + $0x18] sm:$0xf] %vm1388_vm0, %v1747_v29  ;;  %1427 = vst.msk [vmem:[%s2445_s7 + $0x98] sm:$0xf] %vm1388_vm0, %v1779_v30  ;;  %v1748_v33 = vpack.c.bf16 %v1075_v31, %v1075_v31  ;;  %v1780_v34 = vpack.c.bf16 %v1107_v32, %v1107_v32 }
 0x183   : > { %v845_v35 = vpop.f32.mrb[16].mxu0  ;;  %v973_v36 = vpop.f32.mrb[16].mxu1 }
 0x184   : > { %1396 = vst.msk [vmem:[%s2445_s7 + $0x1c] sm:$0xf] %vm1388_vm0, %v1748_v33  ;;  %1428 = vst.msk [vmem:[%s2445_s7 + $0x9c] sm:$0xf] %vm1388_vm0, %v1780_v34  ;;  %v846_v37 = vadd.f32 %v2437_v17, %v845_v35  ;;  %v974_v38 = vadd.f32 %v2437_v17, %v973_v36  ;;  %v847_v39 = vpop.f32.mrb[17].mxu0  ;;  %v975_v40 = vpop.f32.mrb[17].mxu1 }
 0x185   : > { %v848_v41 = vpop.f32.mrb[18].mxu0  ;;  %v976_v42 = vpop.f32.mrb[18].mxu1 }
 0x186   : > { %v1076_v43 = vmax.f32 %v846_v37, 0.0  ;;  %v1108_v44 = vmax.f32 %v974_v38, 0.0  ;;  %v849_v45 = vadd.f32 %v2437_v17, %v848_v41  ;;  %v977_v46 = vadd.f32 %v2437_v17, %v976_v42  ;;  %v850_v47 = vpop.f32.mrb[19].mxu0  ;;  %v978_v48 = vpop.f32.mrb[19].mxu1 }
 0x188   : > { %v1749_v49 = vpack.c.bf16 %v1076_v43, %v1076_v43  ;;  %v1781_v50 = vpack.c.bf16 %v1108_v44, %v1108_v44  ;;  %v1077_v51 = vmax.f32 %v849_v45, 0.0  ;;  %v1109_v52 = vmax.f32 %v977_v46, 0.0 }
 0x18a   : > { %1397 = vst.msk [vmem:[%s2445_s7 + $0x20] sm:$0xf] %vm1388_vm0, %v1749_v49  ;;  %1429 = vst.msk [vmem:[%s2445_s7 + $0xa0] sm:$0xf] %vm1388_vm0, %v1781_v50  ;;  %v1750_v53 = vpack.c.bf16 %v1077_v51, %v1077_v51  ;;  %v1782_v54 = vpack.c.bf16 %v1109_v52, %v1109_v52 }
 0x18b   : > { %v853_v55 = vpop.f32.mrb[20].mxu0  ;;  %v981_v56 = vpop.f32.mrb[20].mxu1 }
 0x18c   : > { %1398 = vst.msk [vmem:[%s2445_s7 + $0x24] sm:$0xf] %vm1388_vm0, %v1750_v53  ;;  %1430 = vst.msk [vmem:[%s2445_s7 + $0xa4] sm:$0xf] %vm1388_vm0, %v1782_v54  ;;  %v854_v57 = vadd.f32 %v2437_v17, %v853_v55  ;;  %v982_v58 = vadd.f32 %v2437_v17, %v981_v56  ;;  %v855_v59 = vpop.f32.mrb[21].mxu0  ;;  %v983_v60 = vpop.f32.mrb[21].mxu1 }
 0x18d   : > { %v856_v61 = vpop.f32.mrb[22].mxu0  ;;  %v984_v62 = vpop.f32.mrb[22].mxu1 }
 0x18e   : > { %v1078_v63 = vmax.f32 %v854_v57, 0.0  ;;  %v1110_v0 = vmax.f32 %v982_v58, 0.0  ;;  %v857_v1 = vadd.f32 %v2437_v17, %v856_v61  ;;  %v985_v2 = vadd.f32 %v2437_v17, %v984_v62  ;;  %v858_v3 = vpop.f32.mrb[23].mxu0  ;;  %v986_v4 = vpop.f32.mrb[23].mxu1 }
 0x190   : > { %v1751_v5 = vpack.c.bf16 %v1078_v63, %v1078_v63  ;;  %v1783_v6 = vpack.c.bf16 %v1110_v0, %v1110_v0  ;;  %v1079_v7 = vmax.f32 %v857_v1, 0.0  ;;  %v1111_v8 = vmax.f32 %v985_v2, 0.0 }
 0x192   : > { %1399 = vst.msk [vmem:[%s2445_s7 + $0x28] sm:$0xf] %vm1388_vm0, %v1751_v5  ;;  %1431 = vst.msk [vmem:[%s2445_s7 + $0xa8] sm:$0xf] %vm1388_vm0, %v1783_v6  ;;  %v1752_v9 = vpack.c.bf16 %v1079_v7, %v1079_v7  ;;  %v1784_v10 = vpack.c.bf16 %v1111_v8, %v1111_v8 }
 0x193   : > { %v861_v11 = vpop.f32.mrb[24].mxu0  ;;  %v989_v12 = vpop.f32.mrb[24].mxu1 }
 0x194   : > { %1400 = vst.msk [vmem:[%s2445_s7 + $0x2c] sm:$0xf] %vm1388_vm0, %v1752_v9  ;;  %1432 = vst.msk [vmem:[%s2445_s7 + $0xac] sm:$0xf] %vm1388_vm0, %v1784_v10  ;;  %v862_v13 = vadd.f32 %v2437_v17, %v861_v11  ;;  %v990_v14 = vadd.f32 %v2437_v17, %v989_v12  ;;  %v863_v15 = vpop.f32.mrb[25].mxu0  ;;  %v991_v16 = vpop.f32.mrb[25].mxu1 }
 0x195   : > { %v864_v18 = vpop.f32.mrb[26].mxu0  ;;  %v992_v19 = vpop.f32.mrb[26].mxu1 }
 0x196   : > { %v1080_v20 = vmax.f32 %v862_v13, 0.0  ;;  %v1112_v21 = vmax.f32 %v990_v14, 0.0  ;;  %v865_v22 = vadd.f32 %v2437_v17, %v864_v18  ;;  %v993_v23 = vadd.f32 %v2437_v17, %v992_v19  ;;  %v866_v24 = vpop.f32.mrb[27].mxu0  ;;  %v994_v25 = vpop.f32.mrb[27].mxu1 }
 0x198   : > { %v1753_v26 = vpack.c.bf16 %v1080_v20, %v1080_v20  ;;  %v1785_v27 = vpack.c.bf16 %v1112_v21, %v1112_v21  ;;  %v1081_v28 = vmax.f32 %v865_v22, 0.0  ;;  %v1113_v29 = vmax.f32 %v993_v23, 0.0 }
 0x19a   : > { %1401 = vst.msk [vmem:[%s2445_s7 + $0x30] sm:$0xf] %vm1388_vm0, %v1753_v26  ;;  %1433 = vst.msk [vmem:[%s2445_s7 + $0xb0] sm:$0xf] %vm1388_vm0, %v1785_v27  ;;  %v1754_v30 = vpack.c.bf16 %v1081_v28, %v1081_v28  ;;  %v1786_v31 = vpack.c.bf16 %v1113_v29, %v1113_v29 }
 0x19b   : > { %v869_v32 = vpop.f32.mrb[28].mxu0  ;;  %v997_v33 = vpop.f32.mrb[28].mxu1 }
 0x19c   : > { %1402 = vst.msk [vmem:[%s2445_s7 + $0x34] sm:$0xf] %vm1388_vm0, %v1754_v30  ;;  %1434 = vst.msk [vmem:[%s2445_s7 + $0xb4] sm:$0xf] %vm1388_vm0, %v1786_v31  ;;  %v870_v34 = vadd.f32 %v2437_v17, %v869_v32  ;;  %v998_v35 = vadd.f32 %v2437_v17, %v997_v33  ;;  %v871_v36 = vpop.f32.mrb[29].mxu0  ;;  %v999_v37 = vpop.f32.mrb[29].mxu1 }
 0x19d   : > { %v872_v38 = vpop.f32.mrb[30].mxu0  ;;  %v1000_v39 = vpop.f32.mrb[30].mxu1 }
 0x19e   : > { %v1082_v40 = vmax.f32 %v870_v34, 0.0  ;;  %v1114_v41 = vmax.f32 %v998_v35, 0.0  ;;  %v873_v42 = vadd.f32 %v2437_v17, %v872_v38  ;;  %v1001_v43 = vadd.f32 %v2437_v17, %v1000_v39  ;;  %v874_v44 = vpop.f32.mrb[31].mxu0  ;;  %v1002_v45 = vpop.f32.mrb[31].mxu1 }
 0x1a0   : > { %v1755_v46 = vpack.c.bf16 %v1082_v40, %v1082_v40  ;;  %v1787_v47 = vpack.c.bf16 %v1114_v41, %v1114_v41  ;;  %v1083_v48 = vmax.f32 %v873_v42, 0.0  ;;  %v1115_v49 = vmax.f32 %v1001_v43, 0.0 }
 0x1a2   : > { %1403 = vst.msk [vmem:[%s2445_s7 + $0x38] sm:$0xf] %vm1388_vm0, %v1755_v46  ;;  %1435 = vst.msk [vmem:[%s2445_s7 + $0xb8] sm:$0xf] %vm1388_vm0, %v1787_v47  ;;  %v1756_v50 = vpack.c.bf16 %v1083_v48, %v1083_v48  ;;  %v1788_v51 = vpack.c.bf16 %v1115_v49, %v1115_v49 }
 0x1a3   : > { %v877_v52 = vpop.f32.mrb[32].mxu0  ;;  %v1005_v53 = vpop.f32.mrb[32].mxu1 }
 0x1a4   : > { %1404 = vst.msk [vmem:[%s2445_s7 + $0x3c] sm:$0xf] %vm1388_vm0, %v1756_v50  ;;  %1436 = vst.msk [vmem:[%s2445_s7 + $0xbc] sm:$0xf] %vm1388_vm0, %v1788_v51  ;;  %v878_v54 = vadd.f32 %v2437_v17, %v877_v52  ;;  %v1006_v55 = vadd.f32 %v2437_v17, %v1005_v53  ;;  %v879_v56 = vpop.f32.mrb[33].mxu0  ;;  %v1007_v57 = vpop.f32.mrb[33].mxu1 }
 0x1a5   : > { %v880_v58 = vpop.f32.mrb[34].mxu0  ;;  %v1008_v59 = vpop.f32.mrb[34].mxu1 }
 0x1a6   : > { %v1084_v60 = vmax.f32 %v878_v54, 0.0  ;;  %v1116_v61 = vmax.f32 %v1006_v55, 0.0  ;;  %v881_v62 = vadd.f32 %v2437_v17, %v880_v58  ;;  %v1009_v63 = vadd.f32 %v2437_v17, %v1008_v59  ;;  %v882_v0 = vpop.f32.mrb[35].mxu0  ;;  %v1010_v1 = vpop.f32.mrb[35].mxu1 }
 0x1a8   : > { %v1757_v2 = vpack.c.bf16 %v1084_v60, %v1084_v60  ;;  %v1789_v3 = vpack.c.bf16 %v1116_v61, %v1116_v61  ;;  %v1085_v4 = vmax.f32 %v881_v62, 0.0  ;;  %v1117_v5 = vmax.f32 %v1009_v63, 0.0 }
 0x1aa   : > { %1405 = vst.msk [vmem:[%s2445_s7 + $0x40] sm:$0xf] %vm1388_vm0, %v1757_v2  ;;  %1437 = vst.msk [vmem:[%s2445_s7 + $0xc0] sm:$0xf] %vm1388_vm0, %v1789_v3  ;;  %v1758_v6 = vpack.c.bf16 %v1085_v4, %v1085_v4  ;;  %v1790_v7 = vpack.c.bf16 %v1117_v5, %v1117_v5 }
 0x1ab   : > { %v885_v8 = vpop.f32.mrb[36].mxu0  ;;  %v1013_v9 = vpop.f32.mrb[36].mxu1 }
 0x1ac   : > { %1406 = vst.msk [vmem:[%s2445_s7 + $0x44] sm:$0xf] %vm1388_vm0, %v1758_v6  ;;  %1438 = vst.msk [vmem:[%s2445_s7 + $0xc4] sm:$0xf] %vm1388_vm0, %v1790_v7  ;;  %v886_v10 = vadd.f32 %v2437_v17, %v885_v8  ;;  %v1014_v11 = vadd.f32 %v2437_v17, %v1013_v9  ;;  %v887_v12 = vpop.f32.mrb[37].mxu0  ;;  %v1015_v13 = vpop.f32.mrb[37].mxu1 }
 0x1ad   : > { %v888_v14 = vpop.f32.mrb[38].mxu0  ;;  %v1016_v15 = vpop.f32.mrb[38].mxu1 }
 0x1ae   : > { %v1086_v16 = vmax.f32 %v886_v10, 0.0  ;;  %v1118_v18 = vmax.f32 %v1014_v11, 0.0  ;;  %v889_v19 = vadd.f32 %v2437_v17, %v888_v14  ;;  %v1017_v20 = vadd.f32 %v2437_v17, %v1016_v15  ;;  %v890_v21 = vpop.f32.mrb[39].mxu0  ;;  %v1018_v22 = vpop.f32.mrb[39].mxu1 }
 0x1b0   : > { %v1759_v23 = vpack.c.bf16 %v1086_v16, %v1086_v16  ;;  %v1791_v24 = vpack.c.bf16 %v1118_v18, %v1118_v18  ;;  %v1087_v25 = vmax.f32 %v889_v19, 0.0  ;;  %v1119_v26 = vmax.f32 %v1017_v20, 0.0 }
 0x1b2   : > { %1407 = vst.msk [vmem:[%s2445_s7 + $0x48] sm:$0xf] %vm1388_vm0, %v1759_v23  ;;  %1439 = vst.msk [vmem:[%s2445_s7 + $0xc8] sm:$0xf] %vm1388_vm0, %v1791_v24  ;;  %v1760_v27 = vpack.c.bf16 %v1087_v25, %v1087_v25  ;;  %v1792_v28 = vpack.c.bf16 %v1119_v26, %v1119_v26 }
 0x1b3   : > { %v893_v29 = vpop.f32.mrb[40].mxu0  ;;  %v1021_v30 = vpop.f32.mrb[40].mxu1 }
 0x1b4   : > { %1408 = vst.msk [vmem:[%s2445_s7 + $0x4c] sm:$0xf] %vm1388_vm0, %v1760_v27  ;;  %1440 = vst.msk [vmem:[%s2445_s7 + $0xcc] sm:$0xf] %vm1388_vm0, %v1792_v28  ;;  %v894_v31 = vadd.f32 %v2437_v17, %v893_v29  ;;  %v1022_v32 = vadd.f32 %v2437_v17, %v1021_v30  ;;  %v895_v33 = vpop.f32.mrb[41].mxu0  ;;  %v1023_v34 = vpop.f32.mrb[41].mxu1 }
 0x1b5   : > { %v896_v35 = vpop.f32.mrb[42].mxu0  ;;  %v1024_v36 = vpop.f32.mrb[42].mxu1 }
 0x1b6   : > { %v1088_v37 = vmax.f32 %v894_v31, 0.0  ;;  %v1120_v38 = vmax.f32 %v1022_v32, 0.0  ;;  %v897_v39 = vadd.f32 %v2437_v17, %v896_v35  ;;  %v1025_v40 = vadd.f32 %v2437_v17, %v1024_v36  ;;  %v898_v41 = vpop.f32.mrb[43].mxu0  ;;  %v1026_v42 = vpop.f32.mrb[43].mxu1 }
 0x1b8   : > { %v1761_v43 = vpack.c.bf16 %v1088_v37, %v1088_v37  ;;  %v1793_v44 = vpack.c.bf16 %v1120_v38, %v1120_v38  ;;  %v1089_v45 = vmax.f32 %v897_v39, 0.0  ;;  %v1121_v46 = vmax.f32 %v1025_v40, 0.0 }
 0x1ba   : > { %1409 = vst.msk [vmem:[%s2445_s7 + $0x50] sm:$0xf] %vm1388_vm0, %v1761_v43  ;;  %1441 = vst.msk [vmem:[%s2445_s7 + $0xd0] sm:$0xf] %vm1388_vm0, %v1793_v44  ;;  %v1762_v47 = vpack.c.bf16 %v1089_v45, %v1089_v45  ;;  %v1794_v48 = vpack.c.bf16 %v1121_v46, %v1121_v46 }
 0x1bb   : > { %v901_v49 = vpop.f32.mrb[44].mxu0  ;;  %v1029_v50 = vpop.f32.mrb[44].mxu1 }
 0x1bc   : > { %1410 = vst.msk [vmem:[%s2445_s7 + $0x54] sm:$0xf] %vm1388_vm0, %v1762_v47  ;;  %1442 = vst.msk [vmem:[%s2445_s7 + $0xd4] sm:$0xf] %vm1388_vm0, %v1794_v48  ;;  %v902_v51 = vadd.f32 %v2437_v17, %v901_v49  ;;  %v1030_v52 = vadd.f32 %v2437_v17, %v1029_v50  ;;  %v903_v53 = vpop.f32.mrb[45].mxu0  ;;  %v1031_v54 = vpop.f32.mrb[45].mxu1 }
 0x1bd   : > { %v904_v55 = vpop.f32.mrb[46].mxu0  ;;  %v1032_v56 = vpop.f32.mrb[46].mxu1 }
 0x1be   : > { %v1090_v57 = vmax.f32 %v902_v51, 0.0  ;;  %v1122_v58 = vmax.f32 %v1030_v52, 0.0  ;;  %v905_v59 = vadd.f32 %v2437_v17, %v904_v55  ;;  %v1033_v60 = vadd.f32 %v2437_v17, %v1032_v56  ;;  %v906_v61 = vpop.f32.mrb[47].mxu0  ;;  %v1034_v62 = vpop.f32.mrb[47].mxu1 }
 0x1c0   : > { %v1763_v63 = vpack.c.bf16 %v1090_v57, %v1090_v57  ;;  %v1795_v0 = vpack.c.bf16 %v1122_v58, %v1122_v58  ;;  %v1091_v1 = vmax.f32 %v905_v59, 0.0  ;;  %v1123_v2 = vmax.f32 %v1033_v60, 0.0 }
 0x1c2   : > { %1411 = vst.msk [vmem:[%s2445_s7 + $0x58] sm:$0xf] %vm1388_vm0, %v1763_v63  ;;  %1443 = vst.msk [vmem:[%s2445_s7 + $0xd8] sm:$0xf] %vm1388_vm0, %v1795_v0  ;;  %v1764_v3 = vpack.c.bf16 %v1091_v1, %v1091_v1  ;;  %v1796_v4 = vpack.c.bf16 %v1123_v2, %v1123_v2 }
 0x1c3   : > { %v909_v5 = vpop.f32.mrb[48].mxu0  ;;  %v1037_v6 = vpop.f32.mrb[48].mxu1 }
 0x1c4   : > { %1412 = vst.msk [vmem:[%s2445_s7 + $0x5c] sm:$0xf] %vm1388_vm0, %v1764_v3  ;;  %1444 = vst.msk [vmem:[%s2445_s7 + $0xdc] sm:$0xf] %vm1388_vm0, %v1796_v4  ;;  %v910_v7 = vadd.f32 %v2437_v17, %v909_v5  ;;  %v1038_v8 = vadd.f32 %v2437_v17, %v1037_v6  ;;  %v911_v9 = vpop.f32.mrb[49].mxu0  ;;  %v1039_v10 = vpop.f32.mrb[49].mxu1 }
 0x1c5   : > { %v912_v11 = vpop.f32.mrb[50].mxu0  ;;  %v1040_v12 = vpop.f32.mrb[50].mxu1 }
 0x1c6   : > { %v1092_v13 = vmax.f32 %v910_v7, 0.0  ;;  %v1124_v14 = vmax.f32 %v1038_v8, 0.0  ;;  %v913_v15 = vadd.f32 %v2437_v17, %v912_v11  ;;  %v1041_v16 = vadd.f32 %v2437_v17, %v1040_v12  ;;  %v914_v18 = vpop.f32.mrb[51].mxu0  ;;  %v1042_v19 = vpop.f32.mrb[51].mxu1 }
 0x1c8   : > { %v1765_v20 = vpack.c.bf16 %v1092_v13, %v1092_v13  ;;  %v1797_v21 = vpack.c.bf16 %v1124_v14, %v1124_v14  ;;  %v1093_v22 = vmax.f32 %v913_v15, 0.0  ;;  %v1125_v23 = vmax.f32 %v1041_v16, 0.0 }
 0x1ca   : > { %1413 = vst.msk [vmem:[%s2445_s7 + $0x60] sm:$0xf] %vm1388_vm0, %v1765_v20  ;;  %1445 = vst.msk [vmem:[%s2445_s7 + $0xe0] sm:$0xf] %vm1388_vm0, %v1797_v21  ;;  %v1766_v24 = vpack.c.bf16 %v1093_v22, %v1093_v22  ;;  %v1798_v25 = vpack.c.bf16 %v1125_v23, %v1125_v23 }
 0x1cb   : > { %v917_v26 = vpop.f32.mrb[52].mxu0  ;;  %v1045_v27 = vpop.f32.mrb[52].mxu1 }
 0x1cc   : > { %1414 = vst.msk [vmem:[%s2445_s7 + $0x64] sm:$0xf] %vm1388_vm0, %v1766_v24  ;;  %1446 = vst.msk [vmem:[%s2445_s7 + $0xe4] sm:$0xf] %vm1388_vm0, %v1798_v25  ;;  %v918_v28 = vadd.f32 %v2437_v17, %v917_v26  ;;  %v1046_v29 = vadd.f32 %v2437_v17, %v1045_v27  ;;  %v919_v30 = vpop.f32.mrb[53].mxu0  ;;  %v1047_v31 = vpop.f32.mrb[53].mxu1 }
 0x1cd   : > { %v920_v32 = vpop.f32.mrb[54].mxu0  ;;  %v1048_v33 = vpop.f32.mrb[54].mxu1 }
 0x1ce   : > { %v1094_v34 = vmax.f32 %v918_v28, 0.0  ;;  %v1126_v35 = vmax.f32 %v1046_v29, 0.0  ;;  %v921_v36 = vadd.f32 %v2437_v17, %v920_v32  ;;  %v1049_v37 = vadd.f32 %v2437_v17, %v1048_v33  ;;  %v922_v38 = vpop.f32.mrb[55].mxu0  ;;  %v1050_v39 = vpop.f32.mrb[55].mxu1 }
 0x1d0   : > { %v1767_v40 = vpack.c.bf16 %v1094_v34, %v1094_v34  ;;  %v1799_v41 = vpack.c.bf16 %v1126_v35, %v1126_v35  ;;  %v1095_v42 = vmax.f32 %v921_v36, 0.0  ;;  %v1127_v43 = vmax.f32 %v1049_v37, 0.0 }
 0x1d2   : > { %1415 = vst.msk [vmem:[%s2445_s7 + $0x68] sm:$0xf] %vm1388_vm0, %v1767_v40  ;;  %1447 = vst.msk [vmem:[%s2445_s7 + $0xe8] sm:$0xf] %vm1388_vm0, %v1799_v41  ;;  %v1768_v44 = vpack.c.bf16 %v1095_v42, %v1095_v42  ;;  %v1800_v45 = vpack.c.bf16 %v1127_v43, %v1127_v43 }
 0x1d3   : > { %v925_v46 = vpop.f32.mrb[56].mxu0  ;;  %v1053_v47 = vpop.f32.mrb[56].mxu1 }
 0x1d4   : > { %1416 = vst.msk [vmem:[%s2445_s7 + $0x6c] sm:$0xf] %vm1388_vm0, %v1768_v44  ;;  %1448 = vst.msk [vmem:[%s2445_s7 + $0xec] sm:$0xf] %vm1388_vm0, %v1800_v45  ;;  %v926_v48 = vadd.f32 %v2437_v17, %v925_v46  ;;  %v1054_v49 = vadd.f32 %v2437_v17, %v1053_v47  ;;  %v927_v50 = vpop.f32.mrb[57].mxu0  ;;  %v1055_v51 = vpop.f32.mrb[57].mxu1 }
 0x1d5   : > { %v928_v52 = vpop.f32.mrb[58].mxu0  ;;  %v1056_v53 = vpop.f32.mrb[58].mxu1 }
 0x1d6   : > { %v1096_v54 = vmax.f32 %v926_v48, 0.0  ;;  %v1128_v55 = vmax.f32 %v1054_v49, 0.0  ;;  %v929_v56 = vadd.f32 %v2437_v17, %v928_v52  ;;  %v1057_v57 = vadd.f32 %v2437_v17, %v1056_v53  ;;  %v930_v58 = vpop.f32.mrb[59].mxu0  ;;  %v1058_v59 = vpop.f32.mrb[59].mxu1 }
 0x1d8   : > { %v1769_v60 = vpack.c.bf16 %v1096_v54, %v1096_v54  ;;  %v1801_v61 = vpack.c.bf16 %v1128_v55, %v1128_v55  ;;  %v1097_v62 = vmax.f32 %v929_v56, 0.0  ;;  %v1129_v63 = vmax.f32 %v1057_v57, 0.0 }
 0x1da   : > { %1417 = vst.msk [vmem:[%s2445_s7 + $0x70] sm:$0xf] %vm1388_vm0, %v1769_v60  ;;  %1449 = vst.msk [vmem:[%s2445_s7 + $0xf0] sm:$0xf] %vm1388_vm0, %v1801_v61  ;;  %v1770_v0 = vpack.c.bf16 %v1097_v62, %v1097_v62  ;;  %v1802_v1 = vpack.c.bf16 %v1129_v63, %v1129_v63 }
 0x1db   : > { %v933_v2 = vpop.f32.mrb[60].mxu0  ;;  %v1061_v3 = vpop.f32.mrb[60].mxu1 }
 0x1dc   : > { %1418 = vst.msk [vmem:[%s2445_s7 + $0x74] sm:$0xf] %vm1388_vm0, %v1770_v0  ;;  %1450 = vst.msk [vmem:[%s2445_s7 + $0xf4] sm:$0xf] %vm1388_vm0, %v1802_v1  ;;  %v934_v4 = vadd.f32 %v2437_v17, %v933_v2  ;;  %v1062_v5 = vadd.f32 %v2437_v17, %v1061_v3  ;;  %v935_v6 = vpop.f32.mrb[61].mxu0  ;;  %v1063_v7 = vpop.f32.mrb[61].mxu1 }
 0x1dd   : > { %v936_v8 = vpop.f32.mrb[62].mxu0  ;;  %v1064_v9 = vpop.f32.mrb[62].mxu1 }
 0x1de   : > { %v1098_v10 = vmax.f32 %v934_v4, 0.0  ;;  %v1130_v11 = vmax.f32 %v1062_v5, 0.0  ;;  %v937_v12 = vadd.f32 %v2437_v17, %v936_v8  ;;  %v1065_v13 = vadd.f32 %v2437_v17, %v1064_v9  ;;  %v938_v14 = vpop.f32.mrb[63].mxu0  ;;  %v1066_v15 = vpop.f32.mrb[63].mxu1 }
 0x1e0   : > { %v1771_v16 = vpack.c.bf16 %v1098_v10, %v1098_v10  ;;  %v1803_v18 = vpack.c.bf16 %v1130_v11, %v1130_v11  ;;  %v1099_v19 = vmax.f32 %v937_v12, 0.0  ;;  %v1131_v20 = vmax.f32 %v1065_v13, 0.0 }
 0x1e2   : > { %1419 = vst.msk [vmem:[%s2445_s7 + $0x78] sm:$0xf] %vm1388_vm0, %v1771_v16  ;;  %1451 = vst.msk [vmem:[%s2445_s7 + $0xf8] sm:$0xf] %vm1388_vm0, %v1803_v18  ;;  %v1772_v17 = vpack.c.bf16 %v1099_v19, %v1099_v19  ;;  %v1804_v21 = vpack.c.bf16 %v1131_v20, %v1131_v20 }
 0x1e4   : > { %1420 = vst.msk [vmem:[%s2445_s7 + $0x7c] sm:$0xf] %vm1388_vm0, %v1772_v17  ;;  %1452 = vst.msk [vmem:[%s2445_s7 + $0xfc] sm:$0xf] %vm1388_vm0, %v1804_v21 }
 0x1e5   : > { %2100 = shalt.err (!%p2097_p6)
}
 0x1e6   : > { %s2101_s26 = scalar_lea.hbm %s2632_s18, 4096  ;;  %s2105_s5 = scalar_lea.hbm %s2695_s3, 262144 }
 0x1e7   : > { %p2102_p7 = scmp.ne.s32.totalorder %s2632_s18, %s2101_s26  ;;  %p2106_p0 = scmp.lt.u32.totalorder %s2632_s18, %s2695_s3 }
 0x1e8   : > { %p2107_p1 = scmp.lt.u32.totalorder %s2105_s5, %s2101_s26  ;;  %p2109_p4 = scmp.lt.u32.totalorder %s2101_s26, %s2632_s18 }
 0x1e9   : > { %p2103_p9 = pnand %p2102_p7, %p2707_p8 }
 0x1ea   : > { %p2108_p13 = por %p2107_p1, %p2106_p0 }
 0x1eb   : > { %p2104_p12 = pneg %p2103_p9 }
 0x1ec   : > { %p2110_p10 = por %p2109_p4, %p2108_p13 }
 0x1ee   : > { %p2111_p11 = pnand %p2110_p10, %p2104_p12 }
 0x1f0   : > { %2114 = shalt.err (!%p2111_p11)
}
 0x1f1   : > { %s2181_s6 = smov 64   ;;  %s2182_s7 = smov 4  }
 0x1f2   : > { %1846 = dma.vmem_to_hbm [thread:$0]  (%p2707_p8), %s2634_s9, 4096, %s2632_s18, %s2646_s15, %s2181_s6, %s2181_s6, %s2182_s7  }
 0x1f3 PF: > { %p1863_p2 = scmp.ge.s32.totalorder %s2173_s17, 2  ;;  %s1483_s8 = sand.u32 1, %s2153_s12  }
 0x1f4   : > { %p2708_p3 = scmp.ne.s32.totalorder %s2701_s24, 0  ;;  %s1484_s10 = scalar_lea.sflag [#allocation4], %s1483_s8 }
 0x1f6   : > { %p1856_p5 = pnand %p1863_p2, %p2708_p3 }
 0x1f8   : > { %2148 = dma.done.wait (!%p1856_p5), %s1484_s10, 4096  }
 0x1f9   : > { %2150 = vsyncadd (!%p1856_p5), %s1484_s10, 4294963200  ;;  %s18_s17 = sadd.s32 1, %s2173_s17   ;;  %s2709_s12 = smov %s2157_s13 }
 0x1fa   : > { %p15_p6 = scmp.ge.s32.totalorder %s18_s17, 66   ;;  %s2710_s13 = smov %s2161_s14 }
 0x1fb   : > { %s2711_s14 = smov %s2256_s25  ;;  %s2712_s15 = smov %s2169_s16 }
 0x1fc   : > { %s2713_s16 = smov %s2715_s20  ;;  %17 = sbr.rel (!%p15_p6) target bundleno = 6 (0x6), region = 78 }
 0x203   :  { %1489 = vsyncpa [#allocation3], 1 }
 0x204   :  { %1491 = vsyncpa [#allocation3 + $0x1], 1 }
 0x205   :  { %1492 = vsyncpa [#allocation6], 1 }
 0x206   :  { %1493 = vsyncpa [#allocation4], 1 }
 0x207   :  { %1495 = vsyncpa [#allocation4 + $0x1], 1 }

</bundles_post_ra>
